<compile_context>
chip_gen: v7x
topology: tpu7x:2x2x1
jax: 0.10.0
libtpu: 0.0.40
codegen_flags: <defaults>
</compile_context>

<pallas_src>
import functools

import jax
import jax.numpy as jnp
from jax.experimental import pallas as pl
from jax.experimental.pallas import tpu as pltpu


# -----------------------------------------------------------------------------
# Pallas kernel: full recurrence (encoder + decoder) for one 8-row batch block.
# -----------------------------------------------------------------------------
def _rnn_kernel(x_ref, w_ih_ref, w_hh_ref, b_ref, w_fc_ref, b_fc_ref, out_ref,
                h_scratch, *, n, t_in):
    """Encoder + decoder LSTM recurrence for one batch block of `n` (=8) rows.

    x_ref:     (1, (T+1)*n, Din)  time-major flattened encoder inputs
    w_ih_ref:  (Din, 4*Hp)        gate k occupies lanes [k*Hp, (k+1)*Hp),
    w_hh_ref:  (Hp, 4*Hp)         gate order [i, f, o, g]
    b_ref:     (1, 4*Hp)          b_ih + b_hh (gate-padded, reordered)
    w_fc_ref:  (Hp, Dp)           Dp = 128 (output lanes zero-padded)
    b_fc_ref:  (1, Dp)
    out_ref:   (1, T*n, Dp)       time-major decoder outputs
    h_scratch: (T*n, Hp)          VMEM scratch for decoder hidden states
    """
    hp = w_hh_ref.shape[0]          # padded hidden size (128)
    g4 = w_hh_ref.shape[1]          # 4 * hp
    t_out = t_in - 1
    f32 = jnp.float32

    def cell(gates, c):
        # gate layout [i | f | o | g]: one wide sigmoid + one tanh per step.
        s = jax.nn.sigmoid(gates[:, 0:3 * hp])
        i = s[:, 0 * hp:1 * hp]
        f = s[:, 1 * hp:2 * hp]
        o = s[:, 2 * hp:3 * hp]
        g = jnp.tanh(gates[:, 3 * hp:4 * hp])
        c_new = f * c + i * g
        h_new = o * jnp.tanh(c_new)
        return h_new, c_new

    # --- all encoder input projections in one batched matmul (bias folded) ---
    x2 = x_ref[0]                                             # ((T+1)*n, Din)
    xp = (jnp.dot(x2, w_ih_ref[...], preferred_element_type=f32)
          + b_ref[...])                                       # ((T+1)*n, 4Hp)

    # --- encoder recurrence; step 0 has h == 0 so its h@W_hh is skipped ---
    # (T is small here; for T >~ 16 convert to lax.fori_loop(unroll=True)
    #  to bound vreg live ranges.)
    c = jnp.zeros((n, hp), f32)
    h, c = cell(xp[0:n, :], c)
    for t in range(1, t_in):
        gates = (jnp.dot(h, w_hh_ref[...], preferred_element_type=f32)
                 + xp[t * n:(t + 1) * n, :])
        h, c = cell(gates, c)

    # --- decoder: input is exactly zero -> gates = h @ W_hh + b ---
    b_dec = jnp.broadcast_to(b_ref[...], (n, g4))             # hoisted once
    for t in range(t_out):
        gates = jnp.dot(h, w_hh_ref[...], preferred_element_type=f32) + b_dec
        h, c = cell(gates, c)
        h_scratch[pl.ds(t * n, n), :] = h                     # aligned store

    # --- batched output head: one fc matmul + one sigmoid + one dense store ---
    logits = (jnp.dot(h_scratch[...], w_fc_ref[...], preferred_element_type=f32)
              + b_fc_ref[...])
    out_ref[0] = jax.nn.sigmoid(logits)


# -----------------------------------------------------------------------------
# Wrapper: module-facing layout in, module-facing layout out.
# -----------------------------------------------------------------------------
@functools.partial(jax.jit, static_argnames=("dout",))
def rnn_forward(x, w_ih_p, w_hh_p, b_p, w_fc_p, b_fc_p, *, dout):
    """x: (N, T+1, Din) float32 -> (N, T, dout) float32."""
    N, Tp1, Din = x.shape
    T = Tp1 - 1
    NBLK = 8                                     # sublane-aligned batch block
    Np = ((N + NBLK - 1) // NBLK) * NBLK
    NB = Np // NBLK
    Hp = w_hh_p.shape[0]
    G4 = w_hh_p.shape[1]
    Dp = w_fc_p.shape[1]                         # 128 (lane-dense output)

    # pad batch to a sublane multiple; lay each 8-row block out time-major:
    # (NB, (T+1)*8, Din)   (layout plumbing, not compute)
    x_pad = jnp.pad(x, ((0, Np - N), (0, 0), (0, 0)))
    x_blk = (x_pad.reshape(NB, NBLK, Tp1, Din)
             .transpose(0, 2, 1, 3)
             .reshape(NB, Tp1 * NBLK, Din))

    out_blk = pl.pallas_call(
        functools.partial(_rnn_kernel, n=NBLK, t_in=Tp1),
        out_shape=jax.ShapeDtypeStruct((NB, T * NBLK, Dp), jnp.float32),
        grid=(NB,),
        in_specs=[
            pl.BlockSpec((1, Tp1 * NBLK, Din), lambda b: (b, 0, 0)),  # x block
            pl.BlockSpec((Din, G4), lambda b: (0, 0)),                # W_ih
            pl.BlockSpec((Hp, G4), lambda b: (0, 0)),                 # W_hh
            pl.BlockSpec((1, G4), lambda b: (0, 0)),                  # bias
            pl.BlockSpec((Hp, Dp), lambda b: (0, 0)),                 # W_fc
            pl.BlockSpec((1, Dp), lambda b: (0, 0)),                  # b_fc
        ],
        out_specs=pl.BlockSpec((1, T * NBLK, Dp), lambda b: (b, 0, 0)),
        scratch_shapes=[pltpu.VMEM((T * NBLK, Hp), jnp.float32)],
        compiler_params=pltpu.CompilerParams(
            dimension_semantics=("parallel",)),   # batch blocks shard on v7x
    )(x_blk, w_ih_p, w_hh_p, b_p, w_fc_p, b_fc_p)

    # (NB, T*8, Dp) time-major blocks -> (N, T, dout)
    out = (out_blk.reshape(NB, T, NBLK, Dp)
           .transpose(0, 2, 1, 3)
           .reshape(Np, T, Dp))
    return out[:N, :, :dout]


def pack_params(w_ih, w_hh, b_ih, b_hh, w_fc, b_fc, hidden, h_pad, out_pad):
    """Pre-transpose torch-layout params, pad hidden dim to h_pad lanes, and
    reorder gates from torch's [i, f, g, o] to [i, f, o, g] so the sigmoid
    gates are lane-contiguous.  All padded rows/columns are zero.  The fc
    output is zero-padded to out_pad lanes for a lane-dense output store.
    """
    reorder = jnp.array([0, 1, 3, 2])            # [i, f, g, o] -> [i, f, o, g]

    def pad_gate_cols(w):            # (4H, K) -> (K, 4*h_pad)
        k = w.shape[1]
        w4 = w.reshape(4, hidden, k)[reorder]
        w4 = jnp.pad(w4, ((0, 0), (0, h_pad - hidden), (0, 0)))
        return jnp.transpose(w4, (2, 0, 1)).reshape(k, 4 * h_pad)

    w_ih_p = pad_gate_cols(w_ih)                                          # (Din, 4Hp)
    w_hh_p = jnp.pad(pad_gate_cols(w_hh), ((0, h_pad - hidden), (0, 0)))  # (Hp, 4Hp)
    b = (b_ih + b_hh).reshape(4, hidden)[reorder]
    b_p = jnp.pad(b, ((0, 0), (0, h_pad - hidden))).reshape(1, 4 * h_pad) # (1, 4Hp)
    out_size = w_fc.shape[0]
    w_fc_p = jnp.pad(w_fc.T, ((0, h_pad - hidden), (0, out_pad - out_size)))  # (Hp, Dp)
    b_fc_p = jnp.pad(b_fc, (0, out_pad - out_size)).reshape(1, -1)            # (1, Dp)
    return w_ih_p, w_hh_p, b_p, w_fc_p, b_fc_p


# -----------------------------------------------------------------------------
# Pure-JAX reference (mirrors torch.nn.LSTMCell + Linear + sigmoid), unpadded.
# -----------------------------------------------------------------------------
def rnn_reference(x, w_ih_t, w_hh_t, b, w_fc_t, b_fc):
    N, Tp1, Din = x.shape
    T = Tp1 - 1
    H = w_hh_t.shape[0]
    h = jnp.zeros((N, H), jnp.float32)
    c = jnp.zeros((N, H), jnp.float32)

    def step(x_t, h, c):
        gates = x_t @ w_ih_t + h @ w_hh_t + b
        i = jax.nn.sigmoid(gates[:, 0 * H:1 * H])
        f = jax.nn.sigmoid(gates[:, 1 * H:2 * H])
        g = jnp.tanh(gates[:, 2 * H:3 * H])
        o = jax.nn.sigmoid(gates[:, 3 * H:4 * H])
        c = f * c + i * g
        h = o * jnp.tanh(c)
        return h, c

    for t in range(Tp1):
        h, c = step(x[:, t, :], h, c)
    outs = []
    zero_in = jnp.zeros((N, Din), jnp.float32)
    for t in range(T):
        h, c = step(zero_in, h, c)
        outs.append(jax.nn.sigmoid(h @ w_fc_t + b_fc)[:, None, :])
    return jnp.concatenate(outs, axis=1)


if __name__ == "__main__":
    # module hyperparameters (defaults of the PyTorch RNN)
    INPUT_SIZE = 9
    HIDDEN_SIZE = 100
    OUTPUT_SIZE = 9
    H_PAD = 128                      # lane-aligned hidden size inside the kernel
    OUT_PAD = 128                    # lane-dense fc output width

    # small example: batch N=2, sequence length T+1 = 8 -> output (2, 7, 9)
    N, SEQ = 2, 8

    key = jax.random.PRNGKey(0)
    k_x, k_wih, k_whh, k_bih, k_bhh, k_wfc, k_bfc = jax.random.split(key, 7)

    # deterministic parameter init (PyTorch-style uniform(-1/sqrt(H), 1/sqrt(H)))
    bound = 1.0 / (HIDDEN_SIZE ** 0.5)
    w_ih = jax.random.uniform(k_wih, (4 * HIDDEN_SIZE, INPUT_SIZE),
                              jnp.float32, -bound, bound)    # torch weight_ih
    w_hh = jax.random.uniform(k_whh, (4 * HIDDEN_SIZE, HIDDEN_SIZE),
                              jnp.float32, -bound, bound)    # torch weight_hh
    b_ih = jax.random.uniform(k_bih, (4 * HIDDEN_SIZE,), jnp.float32, -bound, bound)
    b_hh = jax.random.uniform(k_bhh, (4 * HIDDEN_SIZE,), jnp.float32, -bound, bound)
    w_fc = jax.random.uniform(k_wfc, (OUTPUT_SIZE, HIDDEN_SIZE),
                              jnp.float32, -bound, bound)
    b_fc = jax.random.uniform(k_bfc, (OUTPUT_SIZE,), jnp.float32, -bound, bound)
    # hidden_state0 / cell_state0 / zero_vector are zero Parameters -> handled in-kernel.

    # padded / pre-transposed / gate-reordered params for the kernel
    w_ih_p, w_hh_p, b_p, w_fc_p, b_fc_p = pack_params(
        w_ih, w_hh, b_ih, b_hh, w_fc, b_fc, HIDDEN_SIZE, H_PAD, OUT_PAD)

    x = jax.random.normal(k_x, (N, SEQ, INPUT_SIZE), jnp.float32)

    out = rnn_forward(x, w_ih_p, w_hh_p, b_p, w_fc_p, b_fc_p, dout=OUTPUT_SIZE)
    out = jax.block_until_ready(out)

    # unpadded reference (torch gate order)
    ref = rnn_reference(x, w_ih.T, w_hh.T, (b_ih + b_hh)[None, :],
                        w_fc.T, b_fc[None, :])

    assert out.shape == (N, SEQ - 1, OUTPUT_SIZE), out.shape
    assert jnp.allclose(out, ref, atol=2e-5, rtol=2e-5), \
        f"max abs err {jnp.max(jnp.abs(out - ref))}"

    print("KERNEL_OK")
</pallas_src>

<mosaic_0001>
module attributes {stable_mosaic.version = 11 : i64} {
  func.func @_rnn_kernel(%arg0: i32, %arg1: memref<1x64x9xf32, #tpu.memory_space<vmem>>, %arg2: memref<9x512xf32, #tpu.memory_space<vmem>>, %arg3: memref<128x512xf32, #tpu.memory_space<vmem>>, %arg4: memref<1x512xf32, #tpu.memory_space<vmem>>, %arg5: memref<128x128xf32, #tpu.memory_space<vmem>>, %arg6: memref<1x128xf32, #tpu.memory_space<vmem>>, %arg7: memref<1x56x128xf32, #tpu.memory_space<vmem>>, %arg8: memref<56x128xf32, #tpu.memory_space<vmem>>) attributes {dimension_semantics = [#tpu.dimension_semantics<parallel>], iteration_bounds = array<i64: 1>, scalar_prefetch = 0 : i64, scratch_operands = 1 : i64, tpu.core_type = #tpu.core_type<tc>, window_params = [{transform_indices = @transform_0, window_bounds = array<i64: 1, 64, 9>}, {pipeline_mode = #tpu.pipeline_mode<synchronous>, transform_indices = @transform_1, window_bounds = array<i64: 9, 512>}, {pipeline_mode = #tpu.pipeline_mode<synchronous>, transform_indices = @transform_2, window_bounds = array<i64: 128, 512>}, {pipeline_mode = #tpu.pipeline_mode<synchronous>, transform_indices = @transform_3, window_bounds = array<i64: 1, 512>}, {pipeline_mode = #tpu.pipeline_mode<synchronous>, transform_indices = @transform_4, window_bounds = array<i64: 128, 128>}, {pipeline_mode = #tpu.pipeline_mode<synchronous>, transform_indices = @transform_5, window_bounds = array<i64: 1, 128>}, {transform_indices = @transform_6, window_bounds = array<i64: 1, 56, 128>}]} {
    %c0 = arith.constant 0 : index
    %c0_0 = arith.constant 0 : index
    %c0_1 = arith.constant 0 : index
    %0 = vector.load %arg1[%c0, %c0_0, %c0_1] : memref<1x64x9xf32, #tpu.memory_space<vmem>>, vector<1x64x9xf32>
    %1 = vector.shape_cast %0 : vector<1x64x9xf32> to vector<64x9xf32>
    %c0_2 = arith.constant 0 : index
    %c0_3 = arith.constant 0 : index
    %2 = vector.load %arg2[%c0_2, %c0_3] : memref<9x512xf32, #tpu.memory_space<vmem>>, vector<9x512xf32>
    %cst = arith.constant dense<0.000000e+00> : vector<64x512xf32>
    %3 = tpu.matmul %1, %2, %cst {dimension_numbers = #tpu.dot_dimension_numbers<[1], [0], [0], [1], [0, 0, 1, 1], [], []>} : vector<64x9xf32>, vector<9x512xf32>, vector<64x512xf32> -> vector<64x512xf32>
    %c0_4 = arith.constant 0 : index
    %c0_5 = arith.constant 0 : index
    %4 = vector.load %arg4[%c0_4, %c0_5] : memref<1x512xf32, #tpu.memory_space<vmem>>, vector<1x512xf32>
    %5 = vector.broadcast %4 : vector<1x512xf32> to vector<64x512xf32>
    %6 = arith.addf %3, %5 : vector<64x512xf32>
    %cst_6 = arith.constant 0.000000e+00 : f32
    %7 = vector.broadcast %cst_6 : f32 to vector<8x128xf32>
    %8 = vector.extract_strided_slice %6 {offsets = [0, 0], sizes = [8, 512], strides = [1, 1]} : vector<64x512xf32> to vector<8x512xf32>
    %9 = vector.extract_strided_slice %8 {offsets = [0, 0], sizes = [8, 384], strides = [1, 1]} : vector<8x512xf32> to vector<8x384xf32>
    %10 = arith.negf %9 : vector<8x384xf32>
    %11 = math.exp %10 : vector<8x384xf32>
    %cst_7 = arith.constant 1.000000e+00 : f32
    %12 = vector.broadcast %cst_7 : f32 to vector<8x384xf32>
    %13 = arith.addf %12, %11 : vector<8x384xf32>
    %14 = arith.divf %12, %13 : vector<8x384xf32>
    %15 = vector.extract_strided_slice %14 {offsets = [0, 0], sizes = [8, 128], strides = [1, 1]} : vector<8x384xf32> to vector<8x128xf32>
    %16 = vector.extract_strided_slice %14 {offsets = [0, 128], sizes = [8, 128], strides = [1, 1]} : vector<8x384xf32> to vector<8x128xf32>
    %17 = vector.extract_strided_slice %14 {offsets = [0, 256], sizes = [8, 128], strides = [1, 1]} : vector<8x384xf32> to vector<8x128xf32>
    %18 = vector.extract_strided_slice %8 {offsets = [0, 384], sizes = [8, 128], strides = [1, 1]} : vector<8x512xf32> to vector<8x128xf32>
    %19 = math.tanh %18 : vector<8x128xf32>
    %20 = arith.mulf %16, %7 : vector<8x128xf32>
    %21 = arith.mulf %15, %19 : vector<8x128xf32>
    %22 = arith.addf %20, %21 : vector<8x128xf32>
    %23 = math.tanh %22 : vector<8x128xf32>
    %24 = arith.mulf %17, %23 : vector<8x128xf32>
    %c0_8 = arith.constant 0 : index
    %c0_9 = arith.constant 0 : index
    %25 = vector.load %arg3[%c0_8, %c0_9] : memref<128x512xf32, #tpu.memory_space<vmem>>, vector<128x512xf32>
    %cst_10 = arith.constant dense<0.000000e+00> : vector<8x512xf32>
    %26 = tpu.matmul %24, %25, %cst_10 {dimension_numbers = #tpu.dot_dimension_numbers<[1], [0], [0], [1], [0, 0, 1, 1], [], []>} : vector<8x128xf32>, vector<128x512xf32>, vector<8x512xf32> -> vector<8x512xf32>
    %27 = vector.extract_strided_slice %6 {offsets = [8, 0], sizes = [8, 512], strides = [1, 1]} : vector<64x512xf32> to vector<8x512xf32>
    %28 = arith.addf %26, %27 : vector<8x512xf32>
    %29 = vector.extract_strided_slice %28 {offsets = [0, 0], sizes = [8, 384], strides = [1, 1]} : vector<8x512xf32> to vector<8x384xf32>
    %30 = arith.negf %29 : vector<8x384xf32>
    %31 = math.exp %30 : vector<8x384xf32>
    %cst_11 = arith.constant 1.000000e+00 : f32
    %32 = vector.broadcast %cst_11 : f32 to vector<8x384xf32>
    %33 = arith.addf %32, %31 : vector<8x384xf32>
    %34 = arith.divf %32, %33 : vector<8x384xf32>
    %35 = vector.extract_strided_slice %34 {offsets = [0, 0], sizes = [8, 128], strides = [1, 1]} : vector<8x384xf32> to vector<8x128xf32>
    %36 = vector.extract_strided_slice %34 {offsets = [0, 128], sizes = [8, 128], strides = [1, 1]} : vector<8x384xf32> to vector<8x128xf32>
    %37 = vector.extract_strided_slice %34 {offsets = [0, 256], sizes = [8, 128], strides = [1, 1]} : vector<8x384xf32> to vector<8x128xf32>
    %38 = vector.extract_strided_slice %28 {offsets = [0, 384], sizes = [8, 128], strides = [1, 1]} : vector<8x512xf32> to vector<8x128xf32>
    %39 = math.tanh %38 : vector<8x128xf32>
    %40 = arith.mulf %36, %22 : vector<8x128xf32>
    %41 = arith.mulf %35, %39 : vector<8x128xf32>
    %42 = arith.addf %40, %41 : vector<8x128xf32>
    %43 = math.tanh %42 : vector<8x128xf32>
    %44 = arith.mulf %37, %43 : vector<8x128xf32>
    %c0_12 = arith.constant 0 : index
    %c0_13 = arith.constant 0 : index
    %45 = vector.load %arg3[%c0_12, %c0_13] : memref<128x512xf32, #tpu.memory_space<vmem>>, vector<128x512xf32>
    %cst_14 = arith.constant dense<0.000000e+00> : vector<8x512xf32>
    %46 = tpu.matmul %44, %45, %cst_14 {dimension_numbers = #tpu.dot_dimension_numbers<[1], [0], [0], [1], [0, 0, 1, 1], [], []>} : vector<8x128xf32>, vector<128x512xf32>, vector<8x512xf32> -> vector<8x512xf32>
    %47 = vector.extract_strided_slice %6 {offsets = [16, 0], sizes = [8, 512], strides = [1, 1]} : vector<64x512xf32> to vector<8x512xf32>
    %48 = arith.addf %46, %47 : vector<8x512xf32>
    %49 = vector.extract_strided_slice %48 {offsets = [0, 0], sizes = [8, 384], strides = [1, 1]} : vector<8x512xf32> to vector<8x384xf32>
    %50 = arith.negf %49 : vector<8x384xf32>
    %51 = math.exp %50 : vector<8x384xf32>
    %cst_15 = arith.constant 1.000000e+00 : f32
    %52 = vector.broadcast %cst_15 : f32 to vector<8x384xf32>
    %53 = arith.addf %52, %51 : vector<8x384xf32>
    %54 = arith.divf %52, %53 : vector<8x384xf32>
    %55 = vector.extract_strided_slice %54 {offsets = [0, 0], sizes = [8, 128], strides = [1, 1]} : vector<8x384xf32> to vector<8x128xf32>
    %56 = vector.extract_strided_slice %54 {offsets = [0, 128], sizes = [8, 128], strides = [1, 1]} : vector<8x384xf32> to vector<8x128xf32>
    %57 = vector.extract_strided_slice %54 {offsets = [0, 256], sizes = [8, 128], strides = [1, 1]} : vector<8x384xf32> to vector<8x128xf32>
    %58 = vector.extract_strided_slice %48 {offsets = [0, 384], sizes = [8, 128], strides = [1, 1]} : vector<8x512xf32> to vector<8x128xf32>
    %59 = math.tanh %58 : vector<8x128xf32>
    %60 = arith.mulf %56, %42 : vector<8x128xf32>
    %61 = arith.mulf %55, %59 : vector<8x128xf32>
    %62 = arith.addf %60, %61 : vector<8x128xf32>
    %63 = math.tanh %62 : vector<8x128xf32>
    %64 = arith.mulf %57, %63 : vector<8x128xf32>
    %c0_16 = arith.constant 0 : index
    %c0_17 = arith.constant 0 : index
    %65 = vector.load %arg3[%c0_16, %c0_17] : memref<128x512xf32, #tpu.memory_space<vmem>>, vector<128x512xf32>
    %cst_18 = arith.constant dense<0.000000e+00> : vector<8x512xf32>
    %66 = tpu.matmul %64, %65, %cst_18 {dimension_numbers = #tpu.dot_dimension_numbers<[1], [0], [0], [1], [0, 0, 1, 1], [], []>} : vector<8x128xf32>, vector<128x512xf32>, vector<8x512xf32> -> vector<8x512xf32>
    %67 = vector.extract_strided_slice %6 {offsets = [24, 0], sizes = [8, 512], strides = [1, 1]} : vector<64x512xf32> to vector<8x512xf32>
    %68 = arith.addf %66, %67 : vector<8x512xf32>
    %69 = vector.extract_strided_slice %68 {offsets = [0, 0], sizes = [8, 384], strides = [1, 1]} : vector<8x512xf32> to vector<8x384xf32>
    %70 = arith.negf %69 : vector<8x384xf32>
    %71 = math.exp %70 : vector<8x384xf32>
    %cst_19 = arith.constant 1.000000e+00 : f32
    %72 = vector.broadcast %cst_19 : f32 to vector<8x384xf32>
    %73 = arith.addf %72, %71 : vector<8x384xf32>
    %74 = arith.divf %72, %73 : vector<8x384xf32>
    %75 = vector.extract_strided_slice %74 {offsets = [0, 0], sizes = [8, 128], strides = [1, 1]} : vector<8x384xf32> to vector<8x128xf32>
    %76 = vector.extract_strided_slice %74 {offsets = [0, 128], sizes = [8, 128], strides = [1, 1]} : vector<8x384xf32> to vector<8x128xf32>
    %77 = vector.extract_strided_slice %74 {offsets = [0, 256], sizes = [8, 128], strides = [1, 1]} : vector<8x384xf32> to vector<8x128xf32>
    %78 = vector.extract_strided_slice %68 {offsets = [0, 384], sizes = [8, 128], strides = [1, 1]} : vector<8x512xf32> to vector<8x128xf32>
    %79 = math.tanh %78 : vector<8x128xf32>
    %80 = arith.mulf %76, %62 : vector<8x128xf32>
    %81 = arith.mulf %75, %79 : vector<8x128xf32>
    %82 = arith.addf %80, %81 : vector<8x128xf32>
    %83 = math.tanh %82 : vector<8x128xf32>
    %84 = arith.mulf %77, %83 : vector<8x128xf32>
    %c0_20 = arith.constant 0 : index
    %c0_21 = arith.constant 0 : index
    %85 = vector.load %arg3[%c0_20, %c0_21] : memref<128x512xf32, #tpu.memory_space<vmem>>, vector<128x512xf32>
    %cst_22 = arith.constant dense<0.000000e+00> : vector<8x512xf32>
    %86 = tpu.matmul %84, %85, %cst_22 {dimension_numbers = #tpu.dot_dimension_numbers<[1], [0], [0], [1], [0, 0, 1, 1], [], []>} : vector<8x128xf32>, vector<128x512xf32>, vector<8x512xf32> -> vector<8x512xf32>
    %87 = vector.extract_strided_slice %6 {offsets = [32, 0], sizes = [8, 512], strides = [1, 1]} : vector<64x512xf32> to vector<8x512xf32>
    %88 = arith.addf %86, %87 : vector<8x512xf32>
    %89 = vector.extract_strided_slice %88 {offsets = [0, 0], sizes = [8, 384], strides = [1, 1]} : vector<8x512xf32> to vector<8x384xf32>
    %90 = arith.negf %89 : vector<8x384xf32>
    %91 = math.exp %90 : vector<8x384xf32>
    %cst_23 = arith.constant 1.000000e+00 : f32
    %92 = vector.broadcast %cst_23 : f32 to vector<8x384xf32>
    %93 = arith.addf %92, %91 : vector<8x384xf32>
    %94 = arith.divf %92, %93 : vector<8x384xf32>
    %95 = vector.extract_strided_slice %94 {offsets = [0, 0], sizes = [8, 128], strides = [1, 1]} : vector<8x384xf32> to vector<8x128xf32>
    %96 = vector.extract_strided_slice %94 {offsets = [0, 128], sizes = [8, 128], strides = [1, 1]} : vector<8x384xf32> to vector<8x128xf32>
    %97 = vector.extract_strided_slice %94 {offsets = [0, 256], sizes = [8, 128], strides = [1, 1]} : vector<8x384xf32> to vector<8x128xf32>
    %98 = vector.extract_strided_slice %88 {offsets = [0, 384], sizes = [8, 128], strides = [1, 1]} : vector<8x512xf32> to vector<8x128xf32>
    %99 = math.tanh %98 : vector<8x128xf32>
    %100 = arith.mulf %96, %82 : vector<8x128xf32>
    %101 = arith.mulf %95, %99 : vector<8x128xf32>
    %102 = arith.addf %100, %101 : vector<8x128xf32>
    %103 = math.tanh %102 : vector<8x128xf32>
    %104 = arith.mulf %97, %103 : vector<8x128xf32>
    %c0_24 = arith.constant 0 : index
    %c0_25 = arith.constant 0 : index
    %105 = vector.load %arg3[%c0_24, %c0_25] : memref<128x512xf32, #tpu.memory_space<vmem>>, vector<128x512xf32>
    %cst_26 = arith.constant dense<0.000000e+00> : vector<8x512xf32>
    %106 = tpu.matmul %104, %105, %cst_26 {dimension_numbers = #tpu.dot_dimension_numbers<[1], [0], [0], [1], [0, 0, 1, 1], [], []>} : vector<8x128xf32>, vector<128x512xf32>, vector<8x512xf32> -> vector<8x512xf32>
    %107 = vector.extract_strided_slice %6 {offsets = [40, 0], sizes = [8, 512], strides = [1, 1]} : vector<64x512xf32> to vector<8x512xf32>
    %108 = arith.addf %106, %107 : vector<8x512xf32>
    %109 = vector.extract_strided_slice %108 {offsets = [0, 0], sizes = [8, 384], strides = [1, 1]} : vector<8x512xf32> to vector<8x384xf32>
    %110 = arith.negf %109 : vector<8x384xf32>
    %111 = math.exp %110 : vector<8x384xf32>
    %cst_27 = arith.constant 1.000000e+00 : f32
    %112 = vector.broadcast %cst_27 : f32 to vector<8x384xf32>
    %113 = arith.addf %112, %111 : vector<8x384xf32>
    %114 = arith.divf %112, %113 : vector<8x384xf32>
    %115 = vector.extract_strided_slice %114 {offsets = [0, 0], sizes = [8, 128], strides = [1, 1]} : vector<8x384xf32> to vector<8x128xf32>
    %116 = vector.extract_strided_slice %114 {offsets = [0, 128], sizes = [8, 128], strides = [1, 1]} : vector<8x384xf32> to vector<8x128xf32>
    %117 = vector.extract_strided_slice %114 {offsets = [0, 256], sizes = [8, 128], strides = [1, 1]} : vector<8x384xf32> to vector<8x128xf32>
    %118 = vector.extract_strided_slice %108 {offsets = [0, 384], sizes = [8, 128], strides = [1, 1]} : vector<8x512xf32> to vector<8x128xf32>
    %119 = math.tanh %118 : vector<8x128xf32>
    %120 = arith.mulf %116, %102 : vector<8x128xf32>
    %121 = arith.mulf %115, %119 : vector<8x128xf32>
    %122 = arith.addf %120, %121 : vector<8x128xf32>
    %123 = math.tanh %122 : vector<8x128xf32>
    %124 = arith.mulf %117, %123 : vector<8x128xf32>
    %c0_28 = arith.constant 0 : index
    %c0_29 = arith.constant 0 : index
    %125 = vector.load %arg3[%c0_28, %c0_29] : memref<128x512xf32, #tpu.memory_space<vmem>>, vector<128x512xf32>
    %cst_30 = arith.constant dense<0.000000e+00> : vector<8x512xf32>
    %126 = tpu.matmul %124, %125, %cst_30 {dimension_numbers = #tpu.dot_dimension_numbers<[1], [0], [0], [1], [0, 0, 1, 1], [], []>} : vector<8x128xf32>, vector<128x512xf32>, vector<8x512xf32> -> vector<8x512xf32>
    %127 = vector.extract_strided_slice %6 {offsets = [48, 0], sizes = [8, 512], strides = [1, 1]} : vector<64x512xf32> to vector<8x512xf32>
    %128 = arith.addf %126, %127 : vector<8x512xf32>
    %129 = vector.extract_strided_slice %128 {offsets = [0, 0], sizes = [8, 384], strides = [1, 1]} : vector<8x512xf32> to vector<8x384xf32>
    %130 = arith.negf %129 : vector<8x384xf32>
    %131 = math.exp %130 : vector<8x384xf32>
    %cst_31 = arith.constant 1.000000e+00 : f32
    %132 = vector.broadcast %cst_31 : f32 to vector<8x384xf32>
    %133 = arith.addf %132, %131 : vector<8x384xf32>
    %134 = arith.divf %132, %133 : vector<8x384xf32>
    %135 = vector.extract_strided_slice %134 {offsets = [0, 0], sizes = [8, 128], strides = [1, 1]} : vector<8x384xf32> to vector<8x128xf32>
    %136 = vector.extract_strided_slice %134 {offsets = [0, 128], sizes = [8, 128], strides = [1, 1]} : vector<8x384xf32> to vector<8x128xf32>
    %137 = vector.extract_strided_slice %134 {offsets = [0, 256], sizes = [8, 128], strides = [1, 1]} : vector<8x384xf32> to vector<8x128xf32>
    %138 = vector.extract_strided_slice %128 {offsets = [0, 384], sizes = [8, 128], strides = [1, 1]} : vector<8x512xf32> to vector<8x128xf32>
    %139 = math.tanh %138 : vector<8x128xf32>
    %140 = arith.mulf %136, %122 : vector<8x128xf32>
    %141 = arith.mulf %135, %139 : vector<8x128xf32>
    %142 = arith.addf %140, %141 : vector<8x128xf32>
    %143 = math.tanh %142 : vector<8x128xf32>
    %144 = arith.mulf %137, %143 : vector<8x128xf32>
    %c0_32 = arith.constant 0 : index
    %c0_33 = arith.constant 0 : index
    %145 = vector.load %arg3[%c0_32, %c0_33] : memref<128x512xf32, #tpu.memory_space<vmem>>, vector<128x512xf32>
    %cst_34 = arith.constant dense<0.000000e+00> : vector<8x512xf32>
    %146 = tpu.matmul %144, %145, %cst_34 {dimension_numbers = #tpu.dot_dimension_numbers<[1], [0], [0], [1], [0, 0, 1, 1], [], []>} : vector<8x128xf32>, vector<128x512xf32>, vector<8x512xf32> -> vector<8x512xf32>
    %147 = vector.extract_strided_slice %6 {offsets = [56, 0], sizes = [8, 512], strides = [1, 1]} : vector<64x512xf32> to vector<8x512xf32>
    %148 = arith.addf %146, %147 : vector<8x512xf32>
    %149 = vector.extract_strided_slice %148 {offsets = [0, 0], sizes = [8, 384], strides = [1, 1]} : vector<8x512xf32> to vector<8x384xf32>
    %150 = arith.negf %149 : vector<8x384xf32>
    %151 = math.exp %150 : vector<8x384xf32>
    %cst_35 = arith.constant 1.000000e+00 : f32
    %152 = vector.broadcast %cst_35 : f32 to vector<8x384xf32>
    %153 = arith.addf %152, %151 : vector<8x384xf32>
    %154 = arith.divf %152, %153 : vector<8x384xf32>
    %155 = vector.extract_strided_slice %154 {offsets = [0, 0], sizes = [8, 128], strides = [1, 1]} : vector<8x384xf32> to vector<8x128xf32>
    %156 = vector.extract_strided_slice %154 {offsets = [0, 128], sizes = [8, 128], strides = [1, 1]} : vector<8x384xf32> to vector<8x128xf32>
    %157 = vector.extract_strided_slice %154 {offsets = [0, 256], sizes = [8, 128], strides = [1, 1]} : vector<8x384xf32> to vector<8x128xf32>
    %158 = vector.extract_strided_slice %148 {offsets = [0, 384], sizes = [8, 128], strides = [1, 1]} : vector<8x512xf32> to vector<8x128xf32>
    %159 = math.tanh %158 : vector<8x128xf32>
    %160 = arith.mulf %156, %142 : vector<8x128xf32>
    %161 = arith.mulf %155, %159 : vector<8x128xf32>
    %162 = arith.addf %160, %161 : vector<8x128xf32>
    %163 = math.tanh %162 : vector<8x128xf32>
    %164 = arith.mulf %157, %163 : vector<8x128xf32>
    %c0_36 = arith.constant 0 : index
    %c0_37 = arith.constant 0 : index
    %165 = vector.load %arg4[%c0_36, %c0_37] : memref<1x512xf32, #tpu.memory_space<vmem>>, vector<1x512xf32>
    %166 = vector.shape_cast %165 : vector<1x512xf32> to vector<1x512xf32>
    %167 = vector.broadcast %166 : vector<1x512xf32> to vector<8x512xf32>
    %c0_38 = arith.constant 0 : index
    %c0_39 = arith.constant 0 : index
    %168 = vector.load %arg3[%c0_38, %c0_39] : memref<128x512xf32, #tpu.memory_space<vmem>>, vector<128x512xf32>
    %cst_40 = arith.constant dense<0.000000e+00> : vector<8x512xf32>
    %169 = tpu.matmul %164, %168, %cst_40 {dimension_numbers = #tpu.dot_dimension_numbers<[1], [0], [0], [1], [0, 0, 1, 1], [], []>} : vector<8x128xf32>, vector<128x512xf32>, vector<8x512xf32> -> vector<8x512xf32>
    %170 = arith.addf %169, %167 : vector<8x512xf32>
    %171 = vector.extract_strided_slice %170 {offsets = [0, 0], sizes = [8, 384], strides = [1, 1]} : vector<8x512xf32> to vector<8x384xf32>
    %172 = arith.negf %171 : vector<8x384xf32>
    %173 = math.exp %172 : vector<8x384xf32>
    %cst_41 = arith.constant 1.000000e+00 : f32
    %174 = vector.broadcast %cst_41 : f32 to vector<8x384xf32>
    %175 = arith.addf %174, %173 : vector<8x384xf32>
    %176 = arith.divf %174, %175 : vector<8x384xf32>
    %177 = vector.extract_strided_slice %176 {offsets = [0, 0], sizes = [8, 128], strides = [1, 1]} : vector<8x384xf32> to vector<8x128xf32>
    %178 = vector.extract_strided_slice %176 {offsets = [0, 128], sizes = [8, 128], strides = [1, 1]} : vector<8x384xf32> to vector<8x128xf32>
    %179 = vector.extract_strided_slice %176 {offsets = [0, 256], sizes = [8, 128], strides = [1, 1]} : vector<8x384xf32> to vector<8x128xf32>
    %180 = vector.extract_strided_slice %170 {offsets = [0, 384], sizes = [8, 128], strides = [1, 1]} : vector<8x512xf32> to vector<8x128xf32>
    %181 = math.tanh %180 : vector<8x128xf32>
    %182 = arith.mulf %178, %162 : vector<8x128xf32>
    %183 = arith.mulf %177, %181 : vector<8x128xf32>
    %184 = arith.addf %182, %183 : vector<8x128xf32>
    %185 = math.tanh %184 : vector<8x128xf32>
    %186 = arith.mulf %179, %185 : vector<8x128xf32>
    %c0_42 = arith.constant 0 : index
    %c0_43 = arith.constant 0 : index
    %187 = vector.load %arg8[%c0_42, %c0_43] : memref<56x128xf32, #tpu.memory_space<vmem>>, vector<8x128xf32>
    tpu.vector_store %arg8[%c0_42, %c0_43], %186 {strides = array<i32>} : memref<56x128xf32, #tpu.memory_space<vmem>>, vector<8x128xf32>,
    %c0_44 = arith.constant 0 : index
    %c0_45 = arith.constant 0 : index
    %188 = vector.load %arg3[%c0_44, %c0_45] : memref<128x512xf32, #tpu.memory_space<vmem>>, vector<128x512xf32>
    %cst_46 = arith.constant dense<0.000000e+00> : vector<8x512xf32>
    %189 = tpu.matmul %186, %188, %cst_46 {dimension_numbers = #tpu.dot_dimension_numbers<[1], [0], [0], [1], [0, 0, 1, 1], [], []>} : vector<8x128xf32>, vector<128x512xf32>, vector<8x512xf32> -> vector<8x512xf32>
    %190 = arith.addf %189, %167 : vector<8x512xf32>
    %191 = vector.extract_strided_slice %190 {offsets = [0, 0], sizes = [8, 384], strides = [1, 1]} : vector<8x512xf32> to vector<8x384xf32>
    %192 = arith.negf %191 : vector<8x384xf32>
    %193 = math.exp %192 : vector<8x384xf32>
    %cst_47 = arith.constant 1.000000e+00 : f32
    %194 = vector.broadcast %cst_47 : f32 to vector<8x384xf32>
    %195 = arith.addf %194, %193 : vector<8x384xf32>
    %196 = arith.divf %194, %195 : vector<8x384xf32>
    %197 = vector.extract_strided_slice %196 {offsets = [0, 0], sizes = [8, 128], strides = [1, 1]} : vector<8x384xf32> to vector<8x128xf32>
    %198 = vector.extract_strided_slice %196 {offsets = [0, 128], sizes = [8, 128], strides = [1, 1]} : vector<8x384xf32> to vector<8x128xf32>
    %199 = vector.extract_strided_slice %196 {offsets = [0, 256], sizes = [8, 128], strides = [1, 1]} : vector<8x384xf32> to vector<8x128xf32>
    %200 = vector.extract_strided_slice %190 {offsets = [0, 384], sizes = [8, 128], strides = [1, 1]} : vector<8x512xf32> to vector<8x128xf32>
    %201 = math.tanh %200 : vector<8x128xf32>
    %202 = arith.mulf %198, %184 : vector<8x128xf32>
    %203 = arith.mulf %197, %201 : vector<8x128xf32>
    %204 = arith.addf %202, %203 : vector<8x128xf32>
    %205 = math.tanh %204 : vector<8x128xf32>
    %206 = arith.mulf %199, %205 : vector<8x128xf32>
    %c8 = arith.constant 8 : index
    %c0_48 = arith.constant 0 : index
    %207 = vector.load %arg8[%c8, %c0_48] : memref<56x128xf32, #tpu.memory_space<vmem>>, vector<8x128xf32>
    tpu.vector_store %arg8[%c8, %c0_48], %206 {strides = array<i32>} : memref<56x128xf32, #tpu.memory_space<vmem>>, vector<8x128xf32>,
    %c0_49 = arith.constant 0 : index
    %c0_50 = arith.constant 0 : index
    %208 = vector.load %arg3[%c0_49, %c0_50] : memref<128x512xf32, #tpu.memory_space<vmem>>, vector<128x512xf32>
    %cst_51 = arith.constant dense<0.000000e+00> : vector<8x512xf32>
    %209 = tpu.matmul %206, %208, %cst_51 {dimension_numbers = #tpu.dot_dimension_numbers<[1], [0], [0], [1], [0, 0, 1, 1], [], []>} : vector<8x128xf32>, vector<128x512xf32>, vector<8x512xf32> -> vector<8x512xf32>
    %210 = arith.addf %209, %167 : vector<8x512xf32>
    %211 = vector.extract_strided_slice %210 {offsets = [0, 0], sizes = [8, 384], strides = [1, 1]} : vector<8x512xf32> to vector<8x384xf32>
    %212 = arith.negf %211 : vector<8x384xf32>
    %213 = math.exp %212 : vector<8x384xf32>
    %cst_52 = arith.constant 1.000000e+00 : f32
    %214 = vector.broadcast %cst_52 : f32 to vector<8x384xf32>
    %215 = arith.addf %214, %213 : vector<8x384xf32>
    %216 = arith.divf %214, %215 : vector<8x384xf32>
    %217 = vector.extract_strided_slice %216 {offsets = [0, 0], sizes = [8, 128], strides = [1, 1]} : vector<8x384xf32> to vector<8x128xf32>
    %218 = vector.extract_strided_slice %216 {offsets = [0, 128], sizes = [8, 128], strides = [1, 1]} : vector<8x384xf32> to vector<8x128xf32>
    %219 = vector.extract_strided_slice %216 {offsets = [0, 256], sizes = [8, 128], strides = [1, 1]} : vector<8x384xf32> to vector<8x128xf32>
    %220 = vector.extract_strided_slice %210 {offsets = [0, 384], sizes = [8, 128], strides = [1, 1]} : vector<8x512xf32> to vector<8x128xf32>
    %221 = math.tanh %220 : vector<8x128xf32>
    %222 = arith.mulf %218, %204 : vector<8x128xf32>
    %223 = arith.mulf %217, %221 : vector<8x128xf32>
    %224 = arith.addf %222, %223 : vector<8x128xf32>
    %225 = math.tanh %224 : vector<8x128xf32>
    %226 = arith.mulf %219, %225 : vector<8x128xf32>
    %c16 = arith.constant 16 : index
    %c0_53 = arith.constant 0 : index
    %227 = vector.load %arg8[%c16, %c0_53] : memref<56x128xf32, #tpu.memory_space<vmem>>, vector<8x128xf32>
    tpu.vector_store %arg8[%c16, %c0_53], %226 {strides = array<i32>} : memref<56x128xf32, #tpu.memory_space<vmem>>, vector<8x128xf32>,
    %c0_54 = arith.constant 0 : index
    %c0_55 = arith.constant 0 : index
    %228 = vector.load %arg3[%c0_54, %c0_55] : memref<128x512xf32, #tpu.memory_space<vmem>>, vector<128x512xf32>
    %cst_56 = arith.constant dense<0.000000e+00> : vector<8x512xf32>
    %229 = tpu.matmul %226, %228, %cst_56 {dimension_numbers = #tpu.dot_dimension_numbers<[1], [0], [0], [1], [0, 0, 1, 1], [], []>} : vector<8x128xf32>, vector<128x512xf32>, vector<8x512xf32> -> vector<8x512xf32>
    %230 = arith.addf %229, %167 : vector<8x512xf32>
    %231 = vector.extract_strided_slice %230 {offsets = [0, 0], sizes = [8, 384], strides = [1, 1]} : vector<8x512xf32> to vector<8x384xf32>
    %232 = arith.negf %231 : vector<8x384xf32>
    %233 = math.exp %232 : vector<8x384xf32>
    %cst_57 = arith.constant 1.000000e+00 : f32
    %234 = vector.broadcast %cst_57 : f32 to vector<8x384xf32>
    %235 = arith.addf %234, %233 : vector<8x384xf32>
    %236 = arith.divf %234, %235 : vector<8x384xf32>
    %237 = vector.extract_strided_slice %236 {offsets = [0, 0], sizes = [8, 128], strides = [1, 1]} : vector<8x384xf32> to vector<8x128xf32>
    %238 = vector.extract_strided_slice %236 {offsets = [0, 128], sizes = [8, 128], strides = [1, 1]} : vector<8x384xf32> to vector<8x128xf32>
    %239 = vector.extract_strided_slice %236 {offsets = [0, 256], sizes = [8, 128], strides = [1, 1]} : vector<8x384xf32> to vector<8x128xf32>
    %240 = vector.extract_strided_slice %230 {offsets = [0, 384], sizes = [8, 128], strides = [1, 1]} : vector<8x512xf32> to vector<8x128xf32>
    %241 = math.tanh %240 : vector<8x128xf32>
    %242 = arith.mulf %238, %224 : vector<8x128xf32>
    %243 = arith.mulf %237, %241 : vector<8x128xf32>
    %244 = arith.addf %242, %243 : vector<8x128xf32>
    %245 = math.tanh %244 : vector<8x128xf32>
    %246 = arith.mulf %239, %245 : vector<8x128xf32>
    %c24 = arith.constant 24 : index
    %c0_58 = arith.constant 0 : index
    %247 = vector.load %arg8[%c24, %c0_58] : memref<56x128xf32, #tpu.memory_space<vmem>>, vector<8x128xf32>
    tpu.vector_store %arg8[%c24, %c0_58], %246 {strides = array<i32>} : memref<56x128xf32, #tpu.memory_space<vmem>>, vector<8x128xf32>,
    %c0_59 = arith.constant 0 : index
    %c0_60 = arith.constant 0 : index
    %248 = vector.load %arg3[%c0_59, %c0_60] : memref<128x512xf32, #tpu.memory_space<vmem>>, vector<128x512xf32>
    %cst_61 = arith.constant dense<0.000000e+00> : vector<8x512xf32>
    %249 = tpu.matmul %246, %248, %cst_61 {dimension_numbers = #tpu.dot_dimension_numbers<[1], [0], [0], [1], [0, 0, 1, 1], [], []>} : vector<8x128xf32>, vector<128x512xf32>, vector<8x512xf32> -> vector<8x512xf32>
    %250 = arith.addf %249, %167 : vector<8x512xf32>
    %251 = vector.extract_strided_slice %250 {offsets = [0, 0], sizes = [8, 384], strides = [1, 1]} : vector<8x512xf32> to vector<8x384xf32>
    %252 = arith.negf %251 : vector<8x384xf32>
    %253 = math.exp %252 : vector<8x384xf32>
    %cst_62 = arith.constant 1.000000e+00 : f32
    %254 = vector.broadcast %cst_62 : f32 to vector<8x384xf32>
    %255 = arith.addf %254, %253 : vector<8x384xf32>
    %256 = arith.divf %254, %255 : vector<8x384xf32>
    %257 = vector.extract_strided_slice %256 {offsets = [0, 0], sizes = [8, 128], strides = [1, 1]} : vector<8x384xf32> to vector<8x128xf32>
    %258 = vector.extract_strided_slice %256 {offsets = [0, 128], sizes = [8, 128], strides = [1, 1]} : vector<8x384xf32> to vector<8x128xf32>
    %259 = vector.extract_strided_slice %256 {offsets = [0, 256], sizes = [8, 128], strides = [1, 1]} : vector<8x384xf32> to vector<8x128xf32>
    %260 = vector.extract_strided_slice %250 {offsets = [0, 384], sizes = [8, 128], strides = [1, 1]} : vector<8x512xf32> to vector<8x128xf32>
    %261 = math.tanh %260 : vector<8x128xf32>
    %262 = arith.mulf %258, %244 : vector<8x128xf32>
    %263 = arith.mulf %257, %261 : vector<8x128xf32>
    %264 = arith.addf %262, %263 : vector<8x128xf32>
    %265 = math.tanh %264 : vector<8x128xf32>
    %266 = arith.mulf %259, %265 : vector<8x128xf32>
    %c32 = arith.constant 32 : index
    %c0_63 = arith.constant 0 : index
    %267 = vector.load %arg8[%c32, %c0_63] : memref<56x128xf32, #tpu.memory_space<vmem>>, vector<8x128xf32>
    tpu.vector_store %arg8[%c32, %c0_63], %266 {strides = array<i32>} : memref<56x128xf32, #tpu.memory_space<vmem>>, vector<8x128xf32>,
    %c0_64 = arith.constant 0 : index
    %c0_65 = arith.constant 0 : index
    %268 = vector.load %arg3[%c0_64, %c0_65] : memref<128x512xf32, #tpu.memory_space<vmem>>, vector<128x512xf32>
    %cst_66 = arith.constant dense<0.000000e+00> : vector<8x512xf32>
    %269 = tpu.matmul %266, %268, %cst_66 {dimension_numbers = #tpu.dot_dimension_numbers<[1], [0], [0], [1], [0, 0, 1, 1], [], []>} : vector<8x128xf32>, vector<128x512xf32>, vector<8x512xf32> -> vector<8x512xf32>
    %270 = arith.addf %269, %167 : vector<8x512xf32>
    %271 = vector.extract_strided_slice %270 {offsets = [0, 0], sizes = [8, 384], strides = [1, 1]} : vector<8x512xf32> to vector<8x384xf32>
    %272 = arith.negf %271 : vector<8x384xf32>
    %273 = math.exp %272 : vector<8x384xf32>
    %cst_67 = arith.constant 1.000000e+00 : f32
    %274 = vector.broadcast %cst_67 : f32 to vector<8x384xf32>
    %275 = arith.addf %274, %273 : vector<8x384xf32>
    %276 = arith.divf %274, %275 : vector<8x384xf32>
    %277 = vector.extract_strided_slice %276 {offsets = [0, 0], sizes = [8, 128], strides = [1, 1]} : vector<8x384xf32> to vector<8x128xf32>
    %278 = vector.extract_strided_slice %276 {offsets = [0, 128], sizes = [8, 128], strides = [1, 1]} : vector<8x384xf32> to vector<8x128xf32>
    %279 = vector.extract_strided_slice %276 {offsets = [0, 256], sizes = [8, 128], strides = [1, 1]} : vector<8x384xf32> to vector<8x128xf32>
    %280 = vector.extract_strided_slice %270 {offsets = [0, 384], sizes = [8, 128], strides = [1, 1]} : vector<8x512xf32> to vector<8x128xf32>
    %281 = math.tanh %280 : vector<8x128xf32>
    %282 = arith.mulf %278, %264 : vector<8x128xf32>
    %283 = arith.mulf %277, %281 : vector<8x128xf32>
    %284 = arith.addf %282, %283 : vector<8x128xf32>
    %285 = math.tanh %284 : vector<8x128xf32>
    %286 = arith.mulf %279, %285 : vector<8x128xf32>
    %c40 = arith.constant 40 : index
    %c0_68 = arith.constant 0 : index
    %287 = vector.load %arg8[%c40, %c0_68] : memref<56x128xf32, #tpu.memory_space<vmem>>, vector<8x128xf32>
    tpu.vector_store %arg8[%c40, %c0_68], %286 {strides = array<i32>} : memref<56x128xf32, #tpu.memory_space<vmem>>, vector<8x128xf32>,
    %c0_69 = arith.constant 0 : index
    %c0_70 = arith.constant 0 : index
    %288 = vector.load %arg3[%c0_69, %c0_70] : memref<128x512xf32, #tpu.memory_space<vmem>>, vector<128x512xf32>
    %cst_71 = arith.constant dense<0.000000e+00> : vector<8x512xf32>
    %289 = tpu.matmul %286, %288, %cst_71 {dimension_numbers = #tpu.dot_dimension_numbers<[1], [0], [0], [1], [0, 0, 1, 1], [], []>} : vector<8x128xf32>, vector<128x512xf32>, vector<8x512xf32> -> vector<8x512xf32>
    %290 = arith.addf %289, %167 : vector<8x512xf32>
    %291 = vector.extract_strided_slice %290 {offsets = [0, 0], sizes = [8, 384], strides = [1, 1]} : vector<8x512xf32> to vector<8x384xf32>
    %292 = arith.negf %291 : vector<8x384xf32>
    %293 = math.exp %292 : vector<8x384xf32>
    %cst_72 = arith.constant 1.000000e+00 : f32
    %294 = vector.broadcast %cst_72 : f32 to vector<8x384xf32>
    %295 = arith.addf %294, %293 : vector<8x384xf32>
    %296 = arith.divf %294, %295 : vector<8x384xf32>
    %297 = vector.extract_strided_slice %296 {offsets = [0, 0], sizes = [8, 128], strides = [1, 1]} : vector<8x384xf32> to vector<8x128xf32>
    %298 = vector.extract_strided_slice %296 {offsets = [0, 128], sizes = [8, 128], strides = [1, 1]} : vector<8x384xf32> to vector<8x128xf32>
    %299 = vector.extract_strided_slice %296 {offsets = [0, 256], sizes = [8, 128], strides = [1, 1]} : vector<8x384xf32> to vector<8x128xf32>
    %300 = vector.extract_strided_slice %290 {offsets = [0, 384], sizes = [8, 128], strides = [1, 1]} : vector<8x512xf32> to vector<8x128xf32>
    %301 = math.tanh %300 : vector<8x128xf32>
    %302 = arith.mulf %298, %284 : vector<8x128xf32>
    %303 = arith.mulf %297, %301 : vector<8x128xf32>
    %304 = arith.addf %302, %303 : vector<8x128xf32>
    %305 = math.tanh %304 : vector<8x128xf32>
    %306 = arith.mulf %299, %305 : vector<8x128xf32>
    %c48 = arith.constant 48 : index
    %c0_73 = arith.constant 0 : index
    %307 = vector.load %arg8[%c48, %c0_73] : memref<56x128xf32, #tpu.memory_space<vmem>>, vector<8x128xf32>
    tpu.vector_store %arg8[%c48, %c0_73], %306 {strides = array<i32>} : memref<56x128xf32, #tpu.memory_space<vmem>>, vector<8x128xf32>,
    %c0_74 = arith.constant 0 : index
    %c0_75 = arith.constant 0 : index
    %308 = vector.load %arg8[%c0_74, %c0_75] : memref<56x128xf32, #tpu.memory_space<vmem>>, vector<56x128xf32>
    %c0_76 = arith.constant 0 : index
    %c0_77 = arith.constant 0 : index
    %309 = vector.load %arg5[%c0_76, %c0_77] : memref<128x128xf32, #tpu.memory_space<vmem>>, vector<128x128xf32>
    %cst_78 = arith.constant dense<0.000000e+00> : vector<56x128xf32>
    %310 = tpu.matmul %308, %309, %cst_78 {dimension_numbers = #tpu.dot_dimension_numbers<[1], [0], [0], [1], [0, 0, 1, 1], [], []>} : vector<56x128xf32>, vector<128x128xf32>, vector<56x128xf32> -> vector<56x128xf32>
    %c0_79 = arith.constant 0 : index
    %c0_80 = arith.constant 0 : index
    %311 = vector.load %arg6[%c0_79, %c0_80] : memref<1x128xf32, #tpu.memory_space<vmem>>, vector<1x128xf32>
    %312 = vector.broadcast %311 : vector<1x128xf32> to vector<56x128xf32>
    %313 = arith.addf %310, %312 : vector<56x128xf32>
    %314 = arith.negf %313 : vector<56x128xf32>
    %315 = math.exp %314 : vector<56x128xf32>
    %cst_81 = arith.constant 1.000000e+00 : f32
    %316 = vector.broadcast %cst_81 : f32 to vector<56x128xf32>
    %317 = arith.addf %316, %315 : vector<56x128xf32>
    %318 = arith.divf %316, %317 : vector<56x128xf32>
    %c0_82 = arith.constant 0 : index
    %c0_83 = arith.constant 0 : index
    %c0_84 = arith.constant 0 : index
    %319 = vector.load %arg7[%c0_82, %c0_83, %c0_84] : memref<1x56x128xf32, #tpu.memory_space<vmem>>, vector<1x56x128xf32>
    %320 = vector.shape_cast %319 : vector<1x56x128xf32> to vector<56x128xf32>
    %321 = vector.shape_cast %318 : vector<56x128xf32> to vector<1x56x128xf32>
    tpu.vector_store %arg7[%c0_82, %c0_83, %c0_84], %321 {strides = array<i32>} : memref<1x56x128xf32, #tpu.memory_space<vmem>>, vector<1x56x128xf32>,
    return
  }
  func.func @transform_0(%arg0: i32) -> (i32, i32, i32) {
    %c0_i32 = arith.constant 0 : i32
    %c0_i32_0 = arith.constant 0 : i32
    %c0_i32_1 = arith.constant 0 : i32
    return %arg0, %c0_i32, %c0_i32_0 : i32, i32, i32
  }
  func.func @transform_1(%arg0: i32) -> (i32, i32) {
    %c0_i32 = arith.constant 0 : i32
    %c0_i32_0 = arith.constant 0 : i32
    %c0_i32_1 = arith.constant 0 : i32
    return %c0_i32, %c0_i32_0 : i32, i32
  }
  func.func @transform_2(%arg0: i32) -> (i32, i32) {
    %c0_i32 = arith.constant 0 : i32
    %c0_i32_0 = arith.constant 0 : i32
    %c0_i32_1 = arith.constant 0 : i32
    return %c0_i32, %c0_i32_0 : i32, i32
  }
  func.func @transform_3(%arg0: i32) -> (i32, i32) {
    %c0_i32 = arith.constant 0 : i32
    %c0_i32_0 = arith.constant 0 : i32
    %c0_i32_1 = arith.constant 0 : i32
    return %c0_i32, %c0_i32_0 : i32, i32
  }
  func.func @transform_4(%arg0: i32) -> (i32, i32) {
    %c0_i32 = arith.constant 0 : i32
    %c0_i32_0 = arith.constant 0 : i32
    %c0_i32_1 = arith.constant 0 : i32
    return %c0_i32, %c0_i32_0 : i32, i32
  }
  func.func @transform_5(%arg0: i32) -> (i32, i32) {
    %c0_i32 = arith.constant 0 : i32
    %c0_i32_0 = arith.constant 0 : i32
    %c0_i32_1 = arith.constant 0 : i32
    return %c0_i32, %c0_i32_0 : i32, i32
  }
  func.func @transform_6(%arg0: i32) -> (i32, i32, i32) {
    %c0_i32 = arith.constant 0 : i32
    %c0_i32_0 = arith.constant 0 : i32
    %c0_i32_1 = arith.constant 0 : i32
    return %arg0, %c0_i32, %c0_i32_0 : i32, i32, i32
  }
}

</mosaic_0001>

<bundles_post_ra>
// kernel: rnn_forward.1
= control target key start
LH: loop header
LB: loop body
LE: loop exit
PB: predicated region body
PF: predicated region fallthrough
CT: control target
= control target key end

     0   :  { %11 = vsyncpa [#allocation4], 0  ;;  %s4762_s21 = smov [#allocation3]   ;;  %s5831_s0 = inlined_call_operand.vmem [shape: f32[1,64,9], index: 0, kind: input, shape index: {}]   ;;  %s5832_s1 = inlined_call_operand.vmem [shape: f32[9,512], index: 1, kind: input, shape index: {}]   ;;  %s5833_s2 = inlined_call_operand.hbm [shape: f32[128,512], index: 2, kind: input, shape index: {}]   ;;  %s5834_s3 = inlined_call_operand.vmem [shape: f32[1,512], index: 3, kind: input, shape index: {}]   ;;  %s5835_s4 = inlined_call_operand.vmem [shape: f32[128,128], index: 4, kind: input, shape index: {}]   ;;  %s5836_s5 = inlined_call_operand.vmem [shape: f32[1,128], index: 5, kind: input, shape index: {}]   ;;  %s5837_s6 = inlined_call_operand.vmem [shape: f32[1,56,128], index: 6, kind: output, shape index: {}]  }
   0x1   :  { %s21_s22 = sshll.u32 %s4762_s21, 4  ;;  %s4738_s25 = scalar_lea.hbm %s5833_s2, 8192  ;;  %s22_s22 = int_to_ptr.vmem [resolvable:$true] %s21_s22 }
   0x2   :  { %p4739_p0 = scmp.ne.s32.totalorder %s5833_s2, %s4738_s25  ;;  %p4742_p1 = scmp.lt.u32.totalorder %s4738_s25, %s5833_s2 }
   0x4   :  { %p4744_p2 = pnand %p4742_p1, %p4739_p0 }
   0x6   :  { %4747 = shalt.err (!%p4744_p2)
}
   0x7   :  { %s4748_s30 = scalar_lea.vmem %s22_s22, 8192  ;;  %p4753_p4 = scmp.lt.s32.totalorder %s22_s22, %s22_s22 }
   0x8   :  { %p4749_p3 = scmp.ne.s32.totalorder %s22_s22, %s4748_s30  ;;  %p4754_p5 = scmp.lt.s32.totalorder %s4748_s30, %s4748_s30 }
   0xa   :  { %p4755_p6 = por %p4754_p5, %p4753_p4 }
   0xc   :  { %p4756_p7 = pnand %p4755_p6, %p4749_p3 }
   0xe   :  { %4759 = shalt.err (!%p4756_p7)
}
   0xf   :  { %s4763_s7 = smov 512   ;;  %s4764_s8 = smov 32  }
  0x10   :  { %27 = dma.hbm_to_vmem [thread:$0]  %s5833_s2, 8192, %s22_s22, [#allocation4], %s4763_s7, %s4763_s7, %s4764_s8  }
  0x11   :  { %4760 = dma.done.wait [#allocation4], 8192  }
  0x12   :  { %4761 = vsyncadd [#allocation4], 4294959104  ;;  %v4765_v0 = vmov 0.0   ;;  %vm100_vm0 = vcmask 1040384   ;;  %vm4766_vm1 = vmmov 1   ;;  %v46_v2 = vld [vmem:[%s5832_s1 + $0x8] sm:$0xff] }
  0x13   :  { %177 = vmatprep.mubr.f32.mxu0 %v4765_v0  ;;  %290 = vmatprep.mubr.f32.mxu1 %v4765_v0  ;;  %vm4818_vm2 = vmpackc.low %vm100_vm0, %vm4766_vm1  ;;  %v50_v3 = vld [vmem:[%s5832_s1 + $0x28] sm:$0x1]  ;;  %v45_v4 = vld [vmem:[%s5832_s1] sm:$0xff]  ;;  %vm75_vm3 = vcmask 72704   ;;  %vm4768_vm4 = vmmov 0  }
  0x14   :  { %v3475_v5 = vpack.c.bf16 %v50_v3, %v46_v2  ;;  %v49_v6 = vld [vmem:[%s5832_s1 + $0x20] sm:$0x1]  ;;  %v48_v7 = vld [vmem:[%s5832_s1 + $0x18] sm:$0xff]  ;;  %v47_v10 = vld [vmem:[%s5832_s1 + $0x10] sm:$0xff] }
  0x15   :  { %v3478_v8 = vpack.c.bf16 %v49_v6, %v45_v4  ;;  %v52_v9 = vld [vmem:[%s5832_s1 + $0x38] sm:$0x1]  ;;  %v51_v11 = vld [vmem:[%s5832_s1 + $0x30] sm:$0x1]  ;;  %v37_v14 = vld [vmem:[%s5831_s0] sm:$0xff] }
  0x16   :  { %3477 = vmatprep.subr.msk.bf16.mxu0 %vm4818_vm2, %v3475_v5  ;;  %v3481_v12 = vpack.c.bf16 %v52_v9, %v48_v7  ;;  %v3484_v13 = vpack.c.bf16 %v51_v11, %v47_v10  ;;  %v364_v15 = vld [vmem:[#allocation3 + $0x8] sm:$0xff]  ;;  %v363_v18 = vld [vmem:[#allocation3] sm:$0xff]  ;;  %v39_v34 = vld [vmem:[%s5831_s0 + $0x10] sm:$0xff]  ;;  %v55_v10 = vlaneseq }
  0x17   :  { %3480 = vmatpush1.bf16.msk.msra.mxu0 %vm4818_vm2, %v3478_v8  ;;  %v368_v16 = vld [vmem:[#allocation3 + $0x28] sm:$0xff]  ;;  %v367_v19 = vld [vmem:[#allocation3 + $0x20] sm:$0xff]  ;;  %v40_v41 = vld [vmem:[%s5831_s0 + $0x18] sm:$0xff] }
  0x18   :  { %3483 = vmatprep.subr.msk.bf16.mxu1 %vm4818_vm2, %v3481_v12  ;;  %v4861_v17 = vpack.c.bf16 %v368_v16, %v364_v15  ;;  %v4863_v20 = vpack.c.bf16 %v367_v19, %v363_v18  ;;  %v372_v21 = vld [vmem:[#allocation3 + $0x48] sm:$0xff]  ;;  %v371_v24 = vld [vmem:[#allocation3 + $0x40] sm:$0xff]  ;;  %v43_v61 = vld [vmem:[%s5831_s0 + $0x30] sm:$0xff]  ;;  %v56_v11 = vshrl.u32 %v55_v10, 7 }
  0x19   :  { %3486 = vmatpush1.bf16.msk.msra.mxu1 %vm4818_vm2, %v3484_v13  ;;  %v376_v22 = vld [vmem:[#allocation3 + $0x68] sm:$0xff]  ;;  %v375_v25 = vld [vmem:[#allocation3 + $0x60] sm:$0xff]  ;;  %v366_v5 = vld [vmem:[#allocation3 + $0x18] sm:$0xff] }
  0x1a   :  { %3328 = vmatmul.mubr.msk.f32.vlgmr.msra.gmra.mrb[0].mxu0 %vm75_vm3, %v37_v14  ;;  %3488 = vmatprep.subr.bf16.mxu1 %v4861_v17  ;;  %v4869_v23 = vpack.c.bf16 %v376_v22, %v372_v21  ;;  %v4871_v26 = vpack.c.bf16 %v375_v25, %v371_v24  ;;  %v38_v27 = vld [vmem:[%s5831_s0 + $0x8] sm:$0xff]  ;;  %v379_v31 = vld [vmem:[#allocation3 + $0x80] sm:$0xff]  ;;  %v370_v6 = vld [vmem:[#allocation3 + $0x38] sm:$0xff]  ;;  %v57_v12 = vsub.s32 0, %v56_v11  ;;  %v65_v18 = vsub.s32 2, %v56_v11 }
  0x1b   :  { %183 = vmatprep.mubr.f32.mxu0 %v4765_v0  ;;  %3552 = vmatprep.subr.bf16.mxu0 %v4861_v17  ;;  %v380_v28 = vld [vmem:[#allocation3 + $0x88] sm:$0xff]  ;;  %v383_v32 = vld [vmem:[#allocation3 + $0xa0] sm:$0xff]  ;;  %v44_v7 = vld [vmem:[%s5831_s0 + $0x38] sm:$0xff]  ;;  %v4965_v9 = vpack.c.bf16 %v370_v6, %v366_v5 }
  0x1c   :  { %3338 = vmatmul.mubr.msk.f32.vlgmr.msra.gmra.mrb[0].mxu1 %vm75_vm3, %v37_v14  ;;  %3554 = vmatpush1.bf16.msra.mxu0 %v4863_v20  ;;  %v384_v29 = vld [vmem:[#allocation3 + $0xa8] sm:$0xff]  ;;  %v4884_v33 = vpack.c.bf16 %v383_v32, %v379_v31  ;;  %v387_v38 = vld [vmem:[#allocation3 + $0xc0] sm:$0xff]  ;;  %v61_v14 = vsub.s32 1, %v56_v11  ;;  %v69_v32 = vsub.s32 3, %v56_v11  ;;  %v373_v5 = vld [vmem:[#allocation3 + $0x50] sm:$0xff] }
  0x1d   :  { %296 = vmatprep.mubr.f32.mxu1 %v4765_v0  ;;  %3490 = vmatpush1.bf16.msra.mxu1 %v4863_v20  ;;  %v4882_v30 = vpack.c.bf16 %v384_v29, %v380_v28  ;;  %v388_v35 = vld [vmem:[#allocation3 + $0xc8] sm:$0xff]  ;;  %v391_v39 = vld [vmem:[#allocation3 + $0xe0] sm:$0xff]  ;;  %v377_v6 = vld [vmem:[#allocation3 + $0x70] sm:$0xff] }
  0x1e   :  { %3492 = vmatprep.subr.bf16.mxu1 %v4869_v23  ;;  %3556 = vmatprep.subr.bf16.mxu0 %v4869_v23  ;;  %v392_v36 = vld [vmem:[#allocation3 + $0xe8] sm:$0xff]  ;;  %v4899_v40 = vpack.c.bf16 %v391_v39, %v387_v38  ;;  %v395_v45 = vld [vmem:[#allocation3 + $0x100] sm:$0xff]  ;;  %v386_v10 = vld [vmem:[#allocation3 + $0xb8] sm:$0xff]  ;;  %v5001_v11 = vpack.c.bf16 %v377_v6, %v373_v5 }
  0x1f   :  { %3329 = vmatmul.mubr.msk.f32.gmra.mrb[2].mxu0 %vm75_vm3, %v38_v27  ;;  %v4897_v37 = vpack.c.bf16 %v392_v36, %v388_v35  ;;  %v396_v42 = vld [vmem:[#allocation3 + $0x108] sm:$0xff]  ;;  %v399_v46 = vld [vmem:[#allocation3 + $0x120] sm:$0xff] }
  0x20   :  { %3339 = vmatmul.mubr.msk.f32.gmra.mrb[2].mxu1 %vm75_vm3, %v38_v27  ;;  %3558 = vmatpush1.bf16.msra.mxu0 %v4871_v26  ;;  %v400_v43 = vld [vmem:[#allocation3 + $0x128] sm:$0xff]  ;;  %v4914_v47 = vpack.c.bf16 %v399_v46, %v395_v45  ;;  %v41_v48 = vld [vmem:[%s5831_s0 + $0x20] sm:$0xff] }
  0x21   :  { %3494 = vmatpush1.bf16.msra.mxu1 %v4871_v26  ;;  %302 = vmatprep.mubr.f32.mxu1 %v4765_v0  ;;  %v4912_v44 = vpack.c.bf16 %v400_v43, %v396_v42  ;;  %v404_v49 = vld [vmem:[#allocation3 + $0x148] sm:$0xff]  ;;  %v403_v52 = vld [vmem:[#allocation3 + $0x140] sm:$0xff] }
  0x22   :  { %189 = vmatprep.mubr.f32.mxu0 %v4765_v0  ;;  %3496 = vmatprep.subr.bf16.mxu1 %v4882_v30  ;;  %v408_v50 = vld [vmem:[#allocation3 + $0x168] sm:$0xff]  ;;  %v407_v53 = vld [vmem:[#allocation3 + $0x160] sm:$0xff] }
  0x23   :  { %3560 = vmatprep.subr.bf16.mxu0 %v4882_v30  ;;  %3330 = vmatmul.mubr.msk.f32.gmra.mrb[4].mxu0 %vm75_vm3, %v39_v34  ;;  %v4927_v51 = vpack.c.bf16 %v408_v50, %v404_v49  ;;  %v4929_v54 = vpack.c.bf16 %v407_v53, %v403_v52  ;;  %v42_v55 = vld [vmem:[%s5831_s0 + $0x28] sm:$0xff]  ;;  %v411_v59 = vld [vmem:[#allocation3 + $0x180] sm:$0xff] }
  0x24   :  { %3340 = vmatmul.mubr.msk.f32.gmra.mrb[4].mxu1 %vm75_vm3, %v39_v34  ;;  %3562 = vmatpush1.bf16.msra.mxu0 %v4884_v33  ;;  %v412_v56 = vld [vmem:[#allocation3 + $0x188] sm:$0xff]  ;;  %v415_v60 = vld [vmem:[#allocation3 + $0x1a0] sm:$0xff] }
  0x25   :  { %3498 = vmatpush1.bf16.msra.mxu1 %v4884_v33  ;;  %308 = vmatprep.mubr.f32.mxu1 %v4765_v0  ;;  %v416_v57 = vld [vmem:[#allocation3 + $0x1a8] sm:$0xff]  ;;  %v4947_v62 = vpack.c.bf16 %v415_v60, %v411_v59  ;;  %v419_v3 = vld [vmem:[#allocation3 + $0x1c0] sm:$0xff]  ;;  %v374_v60 = vld [vmem:[#allocation3 + $0x58] sm:$0xff] }
  0x26   :  { %195 = vmatprep.mubr.f32.mxu0 %v4765_v0  ;;  %3500 = vmatprep.subr.bf16.mxu1 %v4897_v37  ;;  %v4939_v58 = vpack.c.bf16 %v416_v57, %v412_v56  ;;  %v420_v63 = vld [vmem:[#allocation3 + $0x1c8] sm:$0xff]  ;;  %v423_v4 = vld [vmem:[#allocation3 + $0x1e0] sm:$0xff]  ;;  %v365_v56 = vld [vmem:[#allocation3 + $0x10] sm:$0xff] }
  0x27   :  { %3564 = vmatprep.subr.bf16.mxu0 %v4897_v37  ;;  %3331 = vmatmul.mubr.msk.f32.gmra.mrb[6].mxu0 %vm75_vm3, %v40_v41  ;;  %v424_v1 = vld [vmem:[#allocation3 + $0x1e8] sm:$0xff]  ;;  %v4962_v8 = vpack.c.bf16 %v423_v4, %v419_v3  ;;  %v53_v13 = vld [vmem:[%s5834_s3] sm:$0xf]  ;;  %v369_v57 = vld [vmem:[#allocation3 + $0x30] sm:$0xff] }
  0x28   :  { %3341 = vmatmul.mubr.msk.f32.gmra.mrb[6].mxu1 %vm75_vm3, %v40_v41  ;;  %3566 = vmatpush1.bf16.msra.mxu0 %v4899_v40  ;;  %v4950_v2 = vpack.c.bf16 %v424_v1, %v420_v63  ;;  %v4981_v15 = vrot.slane %v53_v13, %v57_v12  ;;  %v4983_v16 = vrot.slane %v53_v13, %v61_v14  ;;  %v385_v14 = vld [vmem:[#allocation3 + $0xb0] sm:$0xff] }
  0x29   :  { %3502 = vmatpush1.bf16.msra.mxu1 %v4899_v40  ;;  %314 = vmatprep.mubr.f32.mxu1 %v4765_v0  ;;  %v4987_v28 = vrot.slane %v53_v13, %v65_v18  ;;  %v4990_v35 = vrot.slane %v53_v13, %v69_v32  ;;  %v4996_v1 = vpack.c.bf16 %v369_v57, %v365_v56  ;;  %v381_v13 = vld [vmem:[#allocation3 + $0x90] sm:$0xff]  ;;  %v390_v18 = vld [vmem:[#allocation3 + $0xd8] sm:$0xff] }
  0x2a   :  { %201 = vmatprep.mubr.f32.mxu0 %v4765_v0  ;;  %3504 = vmatprep.subr.bf16.mxu1 %v4912_v44  ;;  %v422_v56 = vld [vmem:[#allocation3 + $0x1d8] sm:$0xff] }
  0x2b   :  { %3568 = vmatprep.subr.bf16.mxu0 %v4912_v44  ;;  %3332 = vmatmul.mubr.msk.f32.gmra.mrb[8].mxu0 %vm75_vm3, %v41_v48  ;;  %v426_v57 = vld [vmem:[#allocation3 + $0x1f8] sm:$0xff] }
  0x2c   :  { %3342 = vmatmul.mubr.msk.f32.gmra.mrb[8].mxu1 %vm75_vm3, %v41_v48  ;;  %3570 = vmatpush1.bf16.msra.mxu0 %v4914_v47 }
  0x2d   :  { %3506 = vmatpush1.bf16.msra.mxu1 %v4914_v47  ;;  %320 = vmatprep.mubr.f32.mxu1 %v4765_v0 }
  0x2e   :  { %207 = vmatprep.mubr.f32.mxu0 %v4765_v0  ;;  %3508 = vmatprep.subr.bf16.mxu1 %v4927_v51 }
  0x2f   :  { %3572 = vmatprep.subr.bf16.mxu0 %v4927_v51  ;;  %3333 = vmatmul.mubr.msk.f32.gmra.mrb[10].mxu0 %vm75_vm3, %v42_v55 }
  0x30   :  { %3343 = vmatmul.mubr.msk.f32.gmra.mrb[10].mxu1 %vm75_vm3, %v42_v55  ;;  %3574 = vmatpush1.bf16.msra.mxu0 %v4929_v54 }
  0x31   :  { %3510 = vmatpush1.bf16.msra.mxu1 %v4929_v54  ;;  %326 = vmatprep.mubr.f32.mxu1 %v4765_v0 }
  0x32   :  { %3512 = vmatprep.subr.bf16.mxu1 %v4939_v58  ;;  %213 = vmatprep.mubr.f32.mxu0 %v4765_v0 }
  0x33   :  { %3576 = vmatprep.subr.bf16.mxu0 %v4939_v58  ;;  %3334 = vmatmul.mubr.msk.f32.gmra.mrb[12].mxu0 %vm75_vm3, %v43_v61 }
  0x34   :  { %3344 = vmatmul.mubr.msk.f32.gmra.mrb[12].mxu1 %vm75_vm3, %v43_v61  ;;  %3578 = vmatpush1.bf16.msra.mxu0 %v4947_v62  ;;  %v378_v61 = vld [vmem:[#allocation3 + $0x78] sm:$0xff] }
  0x35   :  { %3514 = vmatpush1.bf16.msra.mxu1 %v4947_v62  ;;  %332 = vmatprep.mubr.f32.mxu1 %v4765_v0  ;;  %v4998_v4 = vpack.c.bf16 %v378_v61, %v374_v60  ;;  %v5035_v60 = vpack.c.bf16 %v426_v57, %v422_v56  ;;  %v421_v61 = vld [vmem:[#allocation3 + $0x1d0] sm:$0xff] }
  0x36   :  { %3516 = vmatprep.subr.bf16.mxu1 %v4950_v2  ;;  %219 = vmatprep.mubr.f32.mxu0 %v4765_v0 }
  0x37   :  { %3580 = vmatprep.subr.bf16.mxu0 %v4950_v2  ;;  %3335 = vmatmul.mubr.msk.f32.gmra.mrb[14].mxu0 %vm75_vm3, %v44_v7 }
  0x38   :  { %3345 = vmatmul.mubr.msk.f32.gmra.mrb[14].mxu1 %vm75_vm3, %v44_v7  ;;  %3582 = vmatpush1.bf16.msra.mxu0 %v4962_v8  ;;  %v382_v7 = vld [vmem:[#allocation3 + $0x98] sm:$0xff] }
  0x39   :  { %3518 = vmatpush1.bf16.msra.mxu1 %v4962_v8  ;;  %491 = vmatprep.mubr.f32.mxu1 %v4765_v0  ;;  %v5005_v12 = vpack.c.bf16 %v386_v10, %v382_v7 }
  0x3a   :  { %3520 = vmatprep.subr.bf16.mxu1 %v4965_v9  ;;  %657 = vmatprep.mubr.f32.mxu0 %v4765_v0 }
  0x3b   :  { %3616 = vmatprep.subr.bf16.mxu0 %v4861_v17 }
  0xed   :  { %v179_v19 = vpop.f32.mrb[0].mxu0 }
  0xee   :  { %v180_v21 = vadd.f32 %v179_v19, %v4981_v15  ;;  %v181_v22 = vpop.f32.mrb[1].mxu0  ;;  %v394_v19 = vld [vmem:[#allocation3 + $0xf8] sm:$0xff] }
  0xef   :  { %v182_v24 = vadd.f32 %v181_v22, %v4983_v16  ;;  %v292_v25 = vpop.f32.mrb[0].mxu1  ;;  %v5011_v22 = vpack.c.bf16 %v394_v19, %v390_v18 }
  0xf0   :  { %v3346_v27 = vmul.f32 -1.442695, %v180_v21  ;;  %v294_v29 = vpop.f32.mrb[1].mxu1  ;;  %v293_v34 = vadd.f32 %v292_v25, %v4987_v28  ;;  %v5008_v21 = vpack.c.bf16 %v385_v14, %v381_v13  ;;  %v393_v25 = vld [vmem:[#allocation3 + $0xf0] sm:$0xff] }
  0xf1   :  { %v3347_v31 = vmul.f32 -1.442695, %v182_v24  ;;  %v295_v38 = vadd.f32 %v294_v29, %v4990_v35  ;;  %v389_v24 = vld [vmem:[#allocation3 + $0xd0] sm:$0xff]  ;;  %v402_v29 = vld [vmem:[#allocation3 + $0x138] sm:$0xff] }
  0xf2   :  { %4470 = vpow2.f32 %v3346_v27  ;;  %v3348_v36 = vmul.f32 -1.442695, %v293_v34  ;;  %v398_v27 = vld [vmem:[#allocation3 + $0x118] sm:$0xff]  ;;  %v397_v34 = vld [vmem:[#allocation3 + $0x110] sm:$0xff] }
  0xf3   :  { %4472 = vpow2.f32 %v3347_v31  ;;  %v5014_v31 = vpack.c.bf16 %v393_v25, %v389_v24  ;;  %v5017_v32 = vpack.c.bf16 %v402_v29, %v398_v27 }
  0xf4   :  { %4474 = vpow2.f32 %v3348_v36  ;;  %v401_v36 = vld [vmem:[#allocation3 + $0x130] sm:$0xff] }
  0xf5   :  { %4476 = vtanh.f32 %v295_v38  ;;  %v406_v38 = vld [vmem:[#allocation3 + $0x158] sm:$0xff] }
  0xfc   :  { %v4471_v39 = vpop.eup %4470 }
  0xfd   :  { %v4473_v41 = vpop.eup %4472  ;;  %v348_v42 = vadd.f32 1.0, %v4471_v39  ;;  %v410_v39 = vld [vmem:[#allocation3 + $0x178] sm:$0xff] }
  0xfe   :  { %v349_v43 = vadd.f32 1.0, %v4473_v41  ;;  %v4475_v45 = vpop.eup %4474  ;;  %v5020_v41 = vpack.c.bf16 %v401_v36, %v397_v34 }
  0xff   :  { %4478 = vrcp.f32 %v348_v42  ;;  %v4477_v46 = vpop.eup %4476  ;;  %v350_v49 = vadd.f32 1.0, %v4475_v45  ;;  %v5023_v42 = vpack.c.bf16 %v410_v39, %v406_v38  ;;  %v409_v45 = vld [vmem:[#allocation3 + $0x170] sm:$0xff] }
 0x100   :  { %4480 = vrcp.f32 %v349_v43  ;;  %v405_v43 = vld [vmem:[#allocation3 + $0x150] sm:$0xff] }
 0x101   :  { %4482 = vrcp.f32 %v350_v49  ;;  %v5026_v49 = vpack.c.bf16 %v409_v45, %v405_v43 }
 0x109   :  { %v4479_v48 = vpop.eup %4478 }
 0x10a   :  { %v4481_v50 = vpop.eup %4480  ;;  %v359_v52 = vmul.f32 %v4479_v48, %v4477_v46  ;;  %v414_v46 = vld [vmem:[#allocation3 + $0x198] sm:$0xff] }
 0x10b   :  { %v358_v53 = vmul.f32 0.0, %v4481_v50  ;;  %v4483_v59 = vpop.eup %4482  ;;  %v418_v48 = vld [vmem:[#allocation3 + $0x1b8] sm:$0xff] }
 0x10c   :  { %v5029_v50 = vpack.c.bf16 %v418_v48, %v414_v46 }
 0x10d   :  { %v4993_v55 = vadd.f32 %v359_v52, %v358_v53  ;;  %v413_v52 = vld [vmem:[#allocation3 + $0x190] sm:$0xff] }
 0x10e   :  { %v417_v53 = vld [vmem:[#allocation3 + $0x1b0] sm:$0xff] }
 0x10f   :  { %4484 = vtanh.f32 %v4993_v55 }
 0x119   :  { %v4485_v63 = vpop.eup %4484 }
 0x11a   :  { %v362_v3 = vmul.f32 %v4485_v63, %v4483_v59  ;;  %v5032_v59 = vpack.c.bf16 %v417_v53, %v413_v52  ;;  %v425_v63 = vld [vmem:[#allocation3 + $0x1f0] sm:$0xff] }
 0x11b   :  { %v5038_v5 = vpack.c.bf16 %v425_v63, %v421_v61 }
 0x11c   :  { %492 = vmatmul.mubr.f32.vlgmr.msra.gmra.mrb[16].mxu1 %v362_v3 }
 0x11d   :  { %3522 = vmatpush1.bf16.msra.mxu1 %v4996_v1  ;;  %562 = vmatprep.mubr.f32.mxu1 %v4765_v0 }
 0x11e   :  { %3524 = vmatprep.subr.bf16.mxu1 %v4998_v4 }
 0x121   :  { %3526 = vmatpush1.bf16.msra.mxu1 %v5001_v11 }
 0x122   :  { %3528 = vmatprep.subr.bf16.mxu1 %v5005_v12 }
 0x125   :  { %3530 = vmatpush1.bf16.msra.mxu1 %v5008_v21 }
 0x126   :  { %3532 = vmatprep.subr.bf16.mxu1 %v5011_v22 }
 0x129   :  { %3534 = vmatpush1.bf16.msra.mxu1 %v5014_v31 }
 0x12a   :  { %3536 = vmatprep.subr.bf16.mxu1 %v5017_v32 }
 0x12d   :  { %3538 = vmatpush1.bf16.msra.mxu1 %v5020_v41 }
 0x12e   :  { %3540 = vmatprep.subr.bf16.mxu1 %v5023_v42 }
 0x131   :  { %3542 = vmatpush1.bf16.msra.mxu1 %v5026_v49 }
 0x132   :  { %3544 = vmatprep.subr.bf16.mxu1 %v5029_v50 }
 0x135   :  { %3546 = vmatpush1.bf16.msra.mxu1 %v5032_v59 }
 0x136   :  { %3548 = vmatprep.subr.bf16.mxu1 %v5035_v60 }
 0x139   :  { %3550 = vmatpush1.bf16.msra.mxu1 %v5038_v5 }
 0x13a   :  { %3584 = vmatprep.subr.bf16.mxu1 %v4965_v9 }
 0x13c   :  { %563 = vmatmul.mubr.f32.vlgmr.msra.gmra.mrb[2].mxu1 %v362_v3  ;;  %v185_v3 = vpop.f32.mrb[2].mxu0 }
 0x13d   :  { %3586 = vmatpush1.bf16.msra.mxu1 %v4996_v1  ;;  %728 = vmatprep.mubr.f32.mxu1 %v4765_v0  ;;  %v187_v6 = vpop.f32.mrb[3].mxu0  ;;  %v186_v7 = vadd.f32 %v185_v3, %v4981_v15 }
 0x13e   :  { %3588 = vmatprep.subr.bf16.mxu1 %v4998_v4  ;;  %v188_v10 = vadd.f32 %v187_v6, %v4983_v16 }
 0x141   :  { %3590 = vmatpush1.bf16.msra.mxu1 %v5001_v11 }
 0x142   :  { %3592 = vmatprep.subr.bf16.mxu1 %v5005_v12 }
 0x145   :  { %3594 = vmatpush1.bf16.msra.mxu1 %v5008_v21 }
 0x146   :  { %3596 = vmatprep.subr.bf16.mxu1 %v5011_v22 }
 0x149   :  { %3598 = vmatpush1.bf16.msra.mxu1 %v5014_v31 }
 0x14a   :  { %3600 = vmatprep.subr.bf16.mxu1 %v5017_v32 }
 0x14d   :  { %3602 = vmatpush1.bf16.msra.mxu1 %v5020_v41 }
 0x14e   :  { %3604 = vmatprep.subr.bf16.mxu1 %v5023_v42 }
 0x151   :  { %3606 = vmatpush1.bf16.msra.mxu1 %v5026_v49 }
 0x152   :  { %3608 = vmatprep.subr.bf16.mxu1 %v5029_v50 }
 0x155   :  { %3610 = vmatpush1.bf16.msra.mxu1 %v5032_v59 }
 0x156   :  { %3612 = vmatprep.subr.bf16.mxu1 %v5035_v60 }
 0x159   :  { %3614 = vmatpush1.bf16.msra.mxu1 %v5038_v5 }
 0x15a   :  { %3648 = vmatprep.subr.bf16.mxu1 %v4965_v9 }
 0x1ef   :  { %v493_v13 = vpop.f32.mrb[16].mxu1 }
 0x1f0   :  { %v494_v14 = vadd.f32 %v493_v13, %v186_v7  ;;  %v495_v18 = vpop.f32.mrb[17].mxu1 }
 0x1f1   :  { %v496_v19 = vadd.f32 %v495_v18, %v188_v10 }
 0x1f2   :  { %v3349_v25 = vmul.f32 -1.442695, %v494_v14 }
 0x1f3   :  { %v3350_v24 = vmul.f32 -1.442695, %v496_v19 }
 0x1f5   :  { %4486 = vpow2.f32 %v3350_v24 }
 0x1f6   :  { %4488 = vpow2.f32 %v3349_v25 }
 0x1ff   :  { %v4487_v27 = vpop.eup %4486 }
 0x200   :  { %v4489_v29 = vpop.eup %4488  ;;  %v579_v34 = vadd.f32 1.0, %v4487_v27 }
 0x201   :  { %v578_v36 = vadd.f32 1.0, %v4489_v29 }
 0x202   :  { %4490 = vrcp.f32 %v579_v34 }
 0x203   :  { %4492 = vrcp.f32 %v578_v36 }
 0x20c   :  { %v4491_v48 = vpop.eup %4490 }
 0x20d   :  { %v4493_v52 = vpop.eup %4492  ;;  %v588_v57 = vmul.f32 %v4491_v48, %v4993_v55 }
 0x20f   :  { %v564_v38 = vpop.f32.mrb[2].mxu1 }
 0x210   :  { %v4423_v39 = vadd.f32 %v564_v38, %v4987_v28  ;;  %v566_v43 = vpop.f32.mrb[3].mxu1 }
 0x211   :  { %v4424_v45 = vadd.f32 %v566_v43, %v4990_v35 }
 0x212   :  { %v3351_v46 = vmul.f32 -1.442695, %v4423_v39 }
 0x213   :  { %4494 = vtanh.f32 %v4424_v45 }
 0x214   :  { %4496 = vpow2.f32 %v3351_v46 }
 0x21d   :  { %v4495_v53 = vpop.eup %4494 }
 0x21e   :  { %v4497_v56 = vpop.eup %4496  ;;  %v589_v61 = vmul.f32 %v4495_v53, %v4493_v52 }
 0x21f   :  { %v580_v63 = vadd.f32 1.0, %v4497_v56 }
 0x220   :  { %v5065_v3 = vadd.f32 %v589_v61, %v588_v57 }
 0x221   :  { %4498 = vrcp.f32 %v580_v63 }
 0x222   :  { %4500 = vtanh.f32 %v5065_v3 }
 0x22b   :  { %v4499_v6 = vpop.eup %4498 }
 0x22c   :  { %v4501_v7 = vpop.eup %4500 }
 0x22d   :  { %v592_v10 = vmul.f32 %v4501_v7, %v4499_v6 }
 0x22f   :  { %658 = vmatmul.mubr.f32.vlgmr.msra.gmra.mrb[4].mxu0 %v592_v10  ;;  %729 = vmatmul.mubr.f32.vlgmr.msra.gmra.mrb[4].mxu1 %v592_v10 }
 0x230   :  { %3618 = vmatpush1.bf16.msra.mxu0 %v4863_v20  ;;  %3650 = vmatpush1.bf16.msra.mxu1 %v4996_v1 }
 0x231   :  { %3620 = vmatprep.subr.bf16.mxu0 %v4869_v23  ;;  %3652 = vmatprep.subr.bf16.mxu1 %v4998_v4 }
 0x232   :  { %823 = vmatprep.mubr.f32.mxu0 %v4765_v0  ;;  %894 = vmatprep.mubr.f32.mxu1 %v4765_v0 }
 0x234   :  { %3622 = vmatpush1.bf16.msra.mxu0 %v4871_v26  ;;  %3654 = vmatpush1.bf16.msra.mxu1 %v5001_v11 }
 0x235   :  { %3624 = vmatprep.subr.bf16.mxu0 %v4882_v30  ;;  %3656 = vmatprep.subr.bf16.mxu1 %v5005_v12 }
 0x238   :  { %3626 = vmatpush1.bf16.msra.mxu0 %v4884_v33  ;;  %3658 = vmatpush1.bf16.msra.mxu1 %v5008_v21 }
 0x239   :  { %3628 = vmatprep.subr.bf16.mxu0 %v4897_v37  ;;  %3660 = vmatprep.subr.bf16.mxu1 %v5011_v22 }
 0x23c   :  { %3630 = vmatpush1.bf16.msra.mxu0 %v4899_v40  ;;  %3662 = vmatpush1.bf16.msra.mxu1 %v5014_v31 }
 0x23d   :  { %3632 = vmatprep.subr.bf16.mxu0 %v4912_v44  ;;  %3664 = vmatprep.subr.bf16.mxu1 %v5017_v32 }
 0x240   :  { %3634 = vmatpush1.bf16.msra.mxu0 %v4914_v47  ;;  %3666 = vmatpush1.bf16.msra.mxu1 %v5020_v41 }
 0x241   :  { %3636 = vmatprep.subr.bf16.mxu0 %v4927_v51  ;;  %3668 = vmatprep.subr.bf16.mxu1 %v5023_v42 }
 0x244   :  { %3638 = vmatpush1.bf16.msra.mxu0 %v4929_v54  ;;  %3670 = vmatpush1.bf16.msra.mxu1 %v5026_v49 }
 0x245   :  { %3640 = vmatprep.subr.bf16.mxu0 %v4939_v58  ;;  %3672 = vmatprep.subr.bf16.mxu1 %v5029_v50 }
 0x248   :  { %3642 = vmatpush1.bf16.msra.mxu0 %v4947_v62  ;;  %3674 = vmatpush1.bf16.msra.mxu1 %v5032_v59 }
 0x249   :  { %3644 = vmatprep.subr.bf16.mxu0 %v4950_v2  ;;  %3676 = vmatprep.subr.bf16.mxu1 %v5035_v60 }
 0x24c   :  { %3646 = vmatpush1.bf16.msra.mxu0 %v4962_v8  ;;  %3678 = vmatpush1.bf16.msra.mxu1 %v5038_v5 }
 0x24d   :  { %3680 = vmatprep.subr.bf16.mxu0 %v4861_v17  ;;  %3712 = vmatprep.subr.bf16.mxu1 %v4965_v9 }
 0x302   :  { %v659_v55 = vpop.f32.mrb[4].mxu0  ;;  %v730_v13 = vpop.f32.mrb[4].mxu1 }
 0x303   :  { %v4411_v14 = vadd.f32 %v659_v55, %v4981_v15  ;;  %v661_v18 = vpop.f32.mrb[5].mxu0  ;;  %v732_v19 = vpop.f32.mrb[5].mxu1  ;;  %v4425_v29 = vadd.f32 %v730_v13, %v4987_v28 }
 0x304   :  { %v4412_v24 = vadd.f32 %v661_v18, %v4983_v16  ;;  %v4426_v34 = vadd.f32 %v732_v19, %v4990_v35 }
 0x305   :  { %v3352_v25 = vmul.f32 -1.442695, %v4411_v14  ;;  %v3354_v36 = vmul.f32 -1.442695, %v4425_v29 }
 0x306   :  { %v3353_v27 = vmul.f32 -1.442695, %v4412_v24 }
 0x307   :  { %4502 = vpow2.f32 %v3352_v25 }
 0x308   :  { %4504 = vpow2.f32 %v3353_v27 }
 0x309   :  { %4506 = vtanh.f32 %v4426_v34 }
 0x30a   :  { %4508 = vpow2.f32 %v3354_v36 }
 0x311   :  { %v4503_v38 = vpop.eup %4502 }
 0x312   :  { %v744_v39 = vadd.f32 1.0, %v4503_v38  ;;  %v4505_v43 = vpop.eup %4504 }
 0x313   :  { %v745_v45 = vadd.f32 1.0, %v4505_v43  ;;  %v4507_v46 = vpop.eup %4506 }
 0x314   :  { %4510 = vrcp.f32 %v744_v39  ;;  %v4509_v48 = vpop.eup %4508 }
 0x315   :  { %4512 = vrcp.f32 %v745_v45  ;;  %v746_v57 = vadd.f32 1.0, %v4509_v48 }
 0x317   :  { %4514 = vrcp.f32 %v746_v57 }
 0x31e   :  { %v4511_v52 = vpop.eup %4510 }
 0x31f   :  { %v755_v53 = vmul.f32 %v4511_v52, %v4507_v46  ;;  %v4513_v56 = vpop.eup %4512 }
 0x320   :  { %v754_v61 = vmul.f32 %v4513_v56, %v5065_v3 }
 0x321   :  { %v4515_v6 = vpop.eup %4514 }
 0x322   :  { %v5107_v63 = vadd.f32 %v755_v53, %v754_v61 }
 0x324   :  { %4516 = vtanh.f32 %v5107_v63 }
 0x32e   :  { %v4517_v7 = vpop.eup %4516 }
 0x32f   :  { %v758_v10 = vmul.f32 %v4517_v7, %v4515_v6 }
 0x331   :  { %824 = vmatmul.mubr.f32.vlgmr.msra.gmra.mrb[6].mxu0 %v758_v10  ;;  %895 = vmatmul.mubr.f32.vlgmr.msra.gmra.mrb[6].mxu1 %v758_v10 }
 0x332   :  { %3682 = vmatpush1.bf16.msra.mxu0 %v4863_v20  ;;  %3714 = vmatpush1.bf16.msra.mxu1 %v4996_v1 }
 0x333   :  { %3684 = vmatprep.subr.bf16.mxu0 %v4869_v23  ;;  %3716 = vmatprep.subr.bf16.mxu1 %v4998_v4 }
 0x334   :  { %989 = vmatprep.mubr.f32.mxu0 %v4765_v0  ;;  %1060 = vmatprep.mubr.f32.mxu1 %v4765_v0 }
 0x336   :  { %3686 = vmatpush1.bf16.msra.mxu0 %v4871_v26  ;;  %3718 = vmatpush1.bf16.msra.mxu1 %v5001_v11 }
 0x337   :  { %3688 = vmatprep.subr.bf16.mxu0 %v4882_v30  ;;  %3720 = vmatprep.subr.bf16.mxu1 %v5005_v12 }
 0x33a   :  { %3690 = vmatpush1.bf16.msra.mxu0 %v4884_v33  ;;  %3722 = vmatpush1.bf16.msra.mxu1 %v5008_v21 }
 0x33b   :  { %3692 = vmatprep.subr.bf16.mxu0 %v4897_v37  ;;  %3724 = vmatprep.subr.bf16.mxu1 %v5011_v22 }
 0x33e   :  { %3694 = vmatpush1.bf16.msra.mxu0 %v4899_v40  ;;  %3726 = vmatpush1.bf16.msra.mxu1 %v5014_v31 }
 0x33f   :  { %3696 = vmatprep.subr.bf16.mxu0 %v4912_v44  ;;  %3728 = vmatprep.subr.bf16.mxu1 %v5017_v32 }
 0x342   :  { %3698 = vmatpush1.bf16.msra.mxu0 %v4914_v47  ;;  %3730 = vmatpush1.bf16.msra.mxu1 %v5020_v41 }
 0x343   :  { %3700 = vmatprep.subr.bf16.mxu0 %v4927_v51  ;;  %3732 = vmatprep.subr.bf16.mxu1 %v5023_v42 }
 0x346   :  { %3702 = vmatpush1.bf16.msra.mxu0 %v4929_v54  ;;  %3734 = vmatpush1.bf16.msra.mxu1 %v5026_v49 }
 0x347   :  { %3704 = vmatprep.subr.bf16.mxu0 %v4939_v58  ;;  %3736 = vmatprep.subr.bf16.mxu1 %v5029_v50 }
 0x34a   :  { %3706 = vmatpush1.bf16.msra.mxu0 %v4947_v62  ;;  %3738 = vmatpush1.bf16.msra.mxu1 %v5032_v59 }
 0x34b   :  { %3708 = vmatprep.subr.bf16.mxu0 %v4950_v2  ;;  %3740 = vmatprep.subr.bf16.mxu1 %v5035_v60 }
 0x34e   :  { %3710 = vmatpush1.bf16.msra.mxu0 %v4962_v8  ;;  %3742 = vmatpush1.bf16.msra.mxu1 %v5038_v5 }
 0x34f   :  { %3744 = vmatprep.subr.bf16.mxu0 %v4861_v17  ;;  %3776 = vmatprep.subr.bf16.mxu1 %v4965_v9 }
 0x404   :  { %v825_v3 = vpop.f32.mrb[6].mxu0  ;;  %v896_v55 = vpop.f32.mrb[6].mxu1 }
 0x405   :  { %v4413_v13 = vadd.f32 %v825_v3, %v4981_v15  ;;  %v827_v14 = vpop.f32.mrb[7].mxu0  ;;  %v898_v18 = vpop.f32.mrb[7].mxu1  ;;  %v4427_v27 = vadd.f32 %v896_v55, %v4987_v28 }
 0x406   :  { %v4414_v19 = vadd.f32 %v827_v14, %v4983_v16  ;;  %v4428_v29 = vadd.f32 %v898_v18, %v4990_v35 }
 0x407   :  { %v3355_v24 = vmul.f32 -1.442695, %v4413_v13  ;;  %v3357_v34 = vmul.f32 -1.442695, %v4427_v27 }
 0x408   :  { %v3356_v25 = vmul.f32 -1.442695, %v4414_v19 }
 0x409   :  { %4518 = vpow2.f32 %v3355_v24 }
 0x40a   :  { %4520 = vpow2.f32 %v3356_v25 }
 0x40b   :  { %4522 = vtanh.f32 %v4428_v29 }
 0x40c   :  { %4524 = vpow2.f32 %v3357_v34 }
 0x413   :  { %v4519_v36 = vpop.eup %4518 }
 0x414   :  { %v910_v38 = vadd.f32 1.0, %v4519_v36  ;;  %v4521_v39 = vpop.eup %4520 }
 0x415   :  { %v911_v43 = vadd.f32 1.0, %v4521_v39  ;;  %v4523_v45 = vpop.eup %4522 }
 0x416   :  { %4526 = vrcp.f32 %v910_v38  ;;  %v4525_v46 = vpop.eup %4524 }
 0x417   :  { %4528 = vrcp.f32 %v911_v43  ;;  %v912_v56 = vadd.f32 1.0, %v4525_v46 }
 0x419   :  { %4530 = vrcp.f32 %v912_v56 }
 0x420   :  { %v4527_v48 = vpop.eup %4526 }
 0x421   :  { %v921_v52 = vmul.f32 %v4527_v48, %v4523_v45  ;;  %v4529_v53 = vpop.eup %4528 }
 0x422   :  { %v920_v57 = vmul.f32 %v4529_v53, %v5107_v63 }
 0x423   :  { %v4531_v6 = vpop.eup %4530 }
 0x424   :  { %v5149_v61 = vadd.f32 %v921_v52, %v920_v57 }
 0x426   :  { %4532 = vtanh.f32 %v5149_v61 }
 0x430   :  { %v4533_v7 = vpop.eup %4532 }
 0x431   :  { %v924_v10 = vmul.f32 %v4533_v7, %v4531_v6 }
 0x433   :  { %990 = vmatmul.mubr.f32.vlgmr.msra.gmra.mrb[8].mxu0 %v924_v10  ;;  %1061 = vmatmul.mubr.f32.vlgmr.msra.gmra.mrb[8].mxu1 %v924_v10 }
 0x434   :  { %3746 = vmatpush1.bf16.msra.mxu0 %v4863_v20  ;;  %3778 = vmatpush1.bf16.msra.mxu1 %v4996_v1 }
 0x435   :  { %3748 = vmatprep.subr.bf16.mxu0 %v4869_v23  ;;  %3780 = vmatprep.subr.bf16.mxu1 %v4998_v4 }
 0x436   :  { %1155 = vmatprep.mubr.f32.mxu0 %v4765_v0  ;;  %1226 = vmatprep.mubr.f32.mxu1 %v4765_v0 }
 0x438   :  { %3750 = vmatpush1.bf16.msra.mxu0 %v4871_v26  ;;  %3782 = vmatpush1.bf16.msra.mxu1 %v5001_v11 }
 0x439   :  { %3752 = vmatprep.subr.bf16.mxu0 %v4882_v30  ;;  %3784 = vmatprep.subr.bf16.mxu1 %v5005_v12 }
 0x43c   :  { %3754 = vmatpush1.bf16.msra.mxu0 %v4884_v33  ;;  %3786 = vmatpush1.bf16.msra.mxu1 %v5008_v21 }
 0x43d   :  { %3756 = vmatprep.subr.bf16.mxu0 %v4897_v37  ;;  %3788 = vmatprep.subr.bf16.mxu1 %v5011_v22 }
 0x440   :  { %3758 = vmatpush1.bf16.msra.mxu0 %v4899_v40  ;;  %3790 = vmatpush1.bf16.msra.mxu1 %v5014_v31 }
 0x441   :  { %3760 = vmatprep.subr.bf16.mxu0 %v4912_v44  ;;  %3792 = vmatprep.subr.bf16.mxu1 %v5017_v32 }
 0x444   :  { %3762 = vmatpush1.bf16.msra.mxu0 %v4914_v47  ;;  %3794 = vmatpush1.bf16.msra.mxu1 %v5020_v41 }
 0x445   :  { %3764 = vmatprep.subr.bf16.mxu0 %v4927_v51  ;;  %3796 = vmatprep.subr.bf16.mxu1 %v5023_v42 }
 0x448   :  { %3766 = vmatpush1.bf16.msra.mxu0 %v4929_v54  ;;  %3798 = vmatpush1.bf16.msra.mxu1 %v5026_v49 }
 0x449   :  { %3768 = vmatprep.subr.bf16.mxu0 %v4939_v58  ;;  %3800 = vmatprep.subr.bf16.mxu1 %v5029_v50 }
 0x44c   :  { %3770 = vmatpush1.bf16.msra.mxu0 %v4947_v62  ;;  %3802 = vmatpush1.bf16.msra.mxu1 %v5032_v59 }
 0x44d   :  { %3772 = vmatprep.subr.bf16.mxu0 %v4950_v2  ;;  %3804 = vmatprep.subr.bf16.mxu1 %v5035_v60 }
 0x450   :  { %3774 = vmatpush1.bf16.msra.mxu0 %v4962_v8  ;;  %3806 = vmatpush1.bf16.msra.mxu1 %v5038_v5 }
 0x451   :  { %3808 = vmatprep.subr.bf16.mxu0 %v4861_v17  ;;  %3840 = vmatprep.subr.bf16.mxu1 %v4965_v9 }
 0x506   :  { %v991_v63 = vpop.f32.mrb[8].mxu0  ;;  %v1062_v3 = vpop.f32.mrb[8].mxu1 }
 0x507   :  { %v4415_v55 = vadd.f32 %v991_v63, %v4981_v15  ;;  %v993_v13 = vpop.f32.mrb[9].mxu0  ;;  %v1064_v14 = vpop.f32.mrb[9].mxu1  ;;  %v4429_v25 = vadd.f32 %v1062_v3, %v4987_v28 }
 0x508   :  { %v4416_v18 = vadd.f32 %v993_v13, %v4983_v16  ;;  %v4430_v27 = vadd.f32 %v1064_v14, %v4990_v35 }
 0x509   :  { %v3358_v19 = vmul.f32 -1.442695, %v4415_v55  ;;  %v3360_v29 = vmul.f32 -1.442695, %v4429_v25 }
 0x50a   :  { %v3359_v24 = vmul.f32 -1.442695, %v4416_v18 }
 0x50b   :  { %4534 = vpow2.f32 %v3358_v19 }
 0x50c   :  { %4536 = vpow2.f32 %v3359_v24 }
 0x50d   :  { %4538 = vtanh.f32 %v4430_v27 }
 0x50e   :  { %4540 = vpow2.f32 %v3360_v29 }
 0x515   :  { %v4535_v34 = vpop.eup %4534 }
 0x516   :  { %v1076_v36 = vadd.f32 1.0, %v4535_v34  ;;  %v4537_v38 = vpop.eup %4536 }
 0x517   :  { %v1077_v39 = vadd.f32 1.0, %v4537_v38  ;;  %v4539_v43 = vpop.eup %4538 }
 0x518   :  { %4542 = vrcp.f32 %v1076_v36  ;;  %v4541_v45 = vpop.eup %4540 }
 0x519   :  { %4544 = vrcp.f32 %v1077_v39  ;;  %v1078_v53 = vadd.f32 1.0, %v4541_v45 }
 0x51b   :  { %4546 = vrcp.f32 %v1078_v53 }
 0x522   :  { %v4543_v46 = vpop.eup %4542 }
 0x523   :  { %v1087_v48 = vmul.f32 %v4543_v46, %v4539_v43  ;;  %v4545_v52 = vpop.eup %4544 }
 0x524   :  { %v1086_v56 = vmul.f32 %v4545_v52, %v5149_v61 }
 0x525   :  { %v4547_v6 = vpop.eup %4546 }
 0x526   :  { %v5191_v57 = vadd.f32 %v1087_v48, %v1086_v56 }
 0x528   :  { %4548 = vtanh.f32 %v5191_v57 }
 0x532   :  { %v4549_v7 = vpop.eup %4548 }
 0x533   :  { %v1090_v10 = vmul.f32 %v4549_v7, %v4547_v6 }
 0x535   :  { %1156 = vmatmul.mubr.f32.vlgmr.msra.gmra.mrb[10].mxu0 %v1090_v10  ;;  %1227 = vmatmul.mubr.f32.vlgmr.msra.gmra.mrb[10].mxu1 %v1090_v10 }
 0x536   :  { %3810 = vmatpush1.bf16.msra.mxu0 %v4863_v20  ;;  %3842 = vmatpush1.bf16.msra.mxu1 %v4996_v1 }
 0x537   :  { %3812 = vmatprep.subr.bf16.mxu0 %v4869_v23  ;;  %3844 = vmatprep.subr.bf16.mxu1 %v4998_v4 }
 0x538   :  { %1321 = vmatprep.mubr.f32.mxu0 %v4765_v0  ;;  %1392 = vmatprep.mubr.f32.mxu1 %v4765_v0 }
 0x53a   :  { %3814 = vmatpush1.bf16.msra.mxu0 %v4871_v26  ;;  %3846 = vmatpush1.bf16.msra.mxu1 %v5001_v11 }
 0x53b   :  { %3816 = vmatprep.subr.bf16.mxu0 %v4882_v30  ;;  %3848 = vmatprep.subr.bf16.mxu1 %v5005_v12 }
 0x53e   :  { %3818 = vmatpush1.bf16.msra.mxu0 %v4884_v33  ;;  %3850 = vmatpush1.bf16.msra.mxu1 %v5008_v21 }
 0x53f   :  { %3820 = vmatprep.subr.bf16.mxu0 %v4897_v37  ;;  %3852 = vmatprep.subr.bf16.mxu1 %v5011_v22 }
 0x542   :  { %3822 = vmatpush1.bf16.msra.mxu0 %v4899_v40  ;;  %3854 = vmatpush1.bf16.msra.mxu1 %v5014_v31 }
 0x543   :  { %3824 = vmatprep.subr.bf16.mxu0 %v4912_v44  ;;  %3856 = vmatprep.subr.bf16.mxu1 %v5017_v32 }
 0x546   :  { %3826 = vmatpush1.bf16.msra.mxu0 %v4914_v47  ;;  %3858 = vmatpush1.bf16.msra.mxu1 %v5020_v41 }
 0x547   :  { %3828 = vmatprep.subr.bf16.mxu0 %v4927_v51  ;;  %3860 = vmatprep.subr.bf16.mxu1 %v5023_v42 }
 0x54a   :  { %3830 = vmatpush1.bf16.msra.mxu0 %v4929_v54  ;;  %3862 = vmatpush1.bf16.msra.mxu1 %v5026_v49 }
 0x54b   :  { %3832 = vmatprep.subr.bf16.mxu0 %v4939_v58  ;;  %3864 = vmatprep.subr.bf16.mxu1 %v5029_v50 }
 0x54e   :  { %3834 = vmatpush1.bf16.msra.mxu0 %v4947_v62  ;;  %3866 = vmatpush1.bf16.msra.mxu1 %v5032_v59 }
 0x54f   :  { %3836 = vmatprep.subr.bf16.mxu0 %v4950_v2  ;;  %3868 = vmatprep.subr.bf16.mxu1 %v5035_v60 }
 0x552   :  { %3838 = vmatpush1.bf16.msra.mxu0 %v4962_v8  ;;  %3870 = vmatpush1.bf16.msra.mxu1 %v5038_v5 }
 0x553   :  { %3872 = vmatprep.subr.bf16.mxu0 %v4861_v17  ;;  %3904 = vmatprep.subr.bf16.mxu1 %v4965_v9 }
 0x608   :  { %v1157_v61 = vpop.f32.mrb[10].mxu0  ;;  %v1228_v63 = vpop.f32.mrb[10].mxu1 }
 0x609   :  { %v4417_v3 = vadd.f32 %v1157_v61, %v4981_v15  ;;  %v1159_v55 = vpop.f32.mrb[11].mxu0  ;;  %v1230_v13 = vpop.f32.mrb[11].mxu1  ;;  %v4431_v24 = vadd.f32 %v1228_v63, %v4987_v28 }
 0x60a   :  { %v4418_v14 = vadd.f32 %v1159_v55, %v4983_v16  ;;  %v4432_v25 = vadd.f32 %v1230_v13, %v4990_v35 }
 0x60b   :  { %v3361_v18 = vmul.f32 -1.442695, %v4417_v3  ;;  %v3363_v27 = vmul.f32 -1.442695, %v4431_v24 }
 0x60c   :  { %v3362_v19 = vmul.f32 -1.442695, %v4418_v14 }
 0x60d   :  { %4550 = vpow2.f32 %v3361_v18 }
 0x60e   :  { %4552 = vpow2.f32 %v3362_v19 }
 0x60f   :  { %4554 = vtanh.f32 %v4432_v25 }
 0x610   :  { %4556 = vpow2.f32 %v3363_v27 }
 0x617   :  { %v4551_v29 = vpop.eup %4550 }
 0x618   :  { %v1242_v34 = vadd.f32 1.0, %v4551_v29  ;;  %v4553_v36 = vpop.eup %4552 }
 0x619   :  { %v1243_v38 = vadd.f32 1.0, %v4553_v36  ;;  %v4555_v39 = vpop.eup %4554 }
 0x61a   :  { %4558 = vrcp.f32 %v1242_v34  ;;  %v4557_v43 = vpop.eup %4556 }
 0x61b   :  { %4560 = vrcp.f32 %v1243_v38  ;;  %v1244_v52 = vadd.f32 1.0, %v4557_v43 }
 0x61d   :  { %4562 = vrcp.f32 %v1244_v52 }
 0x624   :  { %v4559_v45 = vpop.eup %4558 }
 0x625   :  { %v1253_v46 = vmul.f32 %v4559_v45, %v4555_v39  ;;  %v4561_v48 = vpop.eup %4560 }
 0x626   :  { %v1252_v53 = vmul.f32 %v4561_v48, %v5191_v57 }
 0x627   :  { %v4563_v6 = vpop.eup %4562 }
 0x628   :  { %v5233_v56 = vadd.f32 %v1253_v46, %v1252_v53 }
 0x62a   :  { %4564 = vtanh.f32 %v5233_v56 }
 0x634   :  { %v4565_v7 = vpop.eup %4564 }
 0x635   :  { %v1256_v10 = vmul.f32 %v4565_v7, %v4563_v6  ;;  %v1756_v7 = vld [vmem:[#allocation3] sm:$0xff] }
 0x637   :  { %1322 = vmatmul.mubr.f32.vlgmr.msra.gmra.mrb[12].mxu0 %v1256_v10  ;;  %1393 = vmatmul.mubr.f32.vlgmr.msra.gmra.mrb[12].mxu1 %v1256_v10  ;;  %v1760_v10 = vld [vmem:[#allocation3 + $0x20] sm:$0xff] }
 0x638   :  { %3874 = vmatpush1.bf16.msra.mxu0 %v4863_v20  ;;  %3906 = vmatpush1.bf16.msra.mxu1 %v4996_v1 }
 0x639   :  { %3876 = vmatprep.subr.bf16.mxu0 %v4869_v23  ;;  %3908 = vmatprep.subr.bf16.mxu1 %v4998_v4 }
 0x63a   :  { %1487 = vmatprep.mubr.f32.mxu0 %v4765_v0  ;;  %1558 = vmatprep.mubr.f32.mxu1 %v4765_v0 }
 0x63c   :  { %3878 = vmatpush1.bf16.msra.mxu0 %v4871_v26  ;;  %3910 = vmatpush1.bf16.msra.mxu1 %v5001_v11 }
 0x63d   :  { %3880 = vmatprep.subr.bf16.mxu0 %v4882_v30  ;;  %3912 = vmatprep.subr.bf16.mxu1 %v5005_v12 }
 0x640   :  { %3882 = vmatpush1.bf16.msra.mxu0 %v4884_v33  ;;  %3914 = vmatpush1.bf16.msra.mxu1 %v5008_v21 }
 0x641   :  { %3884 = vmatprep.subr.bf16.mxu0 %v4897_v37  ;;  %3916 = vmatprep.subr.bf16.mxu1 %v5011_v22 }
 0x644   :  { %3886 = vmatpush1.bf16.msra.mxu0 %v4899_v40  ;;  %3918 = vmatpush1.bf16.msra.mxu1 %v5014_v31 }
 0x645   :  { %3888 = vmatprep.subr.bf16.mxu0 %v4912_v44  ;;  %3920 = vmatprep.subr.bf16.mxu1 %v5017_v32 }
 0x648   :  { %3890 = vmatpush1.bf16.msra.mxu0 %v4914_v47  ;;  %3922 = vmatpush1.bf16.msra.mxu1 %v5020_v41 }
 0x649   :  { %3892 = vmatprep.subr.bf16.mxu0 %v4927_v51  ;;  %3924 = vmatprep.subr.bf16.mxu1 %v5023_v42 }
 0x64c   :  { %3894 = vmatpush1.bf16.msra.mxu0 %v4929_v54  ;;  %3926 = vmatpush1.bf16.msra.mxu1 %v5026_v49 }
 0x64d   :  { %3896 = vmatprep.subr.bf16.mxu0 %v4939_v58  ;;  %3928 = vmatprep.subr.bf16.mxu1 %v5029_v50 }
 0x650   :  { %3898 = vmatpush1.bf16.msra.mxu0 %v4947_v62  ;;  %3930 = vmatpush1.bf16.msra.mxu1 %v5032_v59 }
 0x651   :  { %3900 = vmatprep.subr.bf16.mxu0 %v4950_v2  ;;  %3932 = vmatprep.subr.bf16.mxu1 %v5035_v60 }
 0x654   :  { %3902 = vmatpush1.bf16.msra.mxu0 %v4962_v8  ;;  %3934 = vmatpush1.bf16.msra.mxu1 %v5038_v5 }
 0x655   :  { %3936 = vmatprep.subr.bf16.mxu0 %v4861_v17  ;;  %3968 = vmatprep.subr.bf16.mxu1 %v4965_v9 }
 0x70a   :  { %v1323_v57 = vpop.f32.mrb[12].mxu0  ;;  %v1394_v61 = vpop.f32.mrb[12].mxu1 }
 0x70b   :  { %v4419_v63 = vadd.f32 %v1323_v57, %v4981_v15  ;;  %v1325_v3 = vpop.f32.mrb[13].mxu0  ;;  %v1396_v55 = vpop.f32.mrb[13].mxu1  ;;  %v4433_v19 = vadd.f32 %v1394_v61, %v4987_v28  ;;  %v5324_v61 = vpack.c.bf16 %v1760_v10, %v1756_v7  ;;  %v1799_v7 = vld [vmem:[#allocation3 + $0x158] sm:$0xff] }
 0x70c   :  { %v4420_v13 = vadd.f32 %v1325_v3, %v4983_v16  ;;  %v4434_v24 = vadd.f32 %v1396_v55, %v4990_v35  ;;  %v1762_v3 = vld [vmem:[#allocation3 + $0x30] sm:$0xff] }
 0x70d   :  { %v3364_v14 = vmul.f32 -1.442695, %v4419_v63  ;;  %v3366_v25 = vmul.f32 -1.442695, %v4433_v19  ;;  %v1758_v63 = vld [vmem:[#allocation3 + $0x10] sm:$0xff] }
 0x70e   :  { %v3365_v18 = vmul.f32 -1.442695, %v4420_v13  ;;  %v5327_v55 = vpack.c.bf16 %v1762_v3, %v1758_v63  ;;  %v1765_v13 = vld [vmem:[#allocation3 + $0x48] sm:$0xff]  ;;  %v1803_v63 = vld [vmem:[#allocation3 + $0x178] sm:$0xff]  ;;  %v1796_v3 = vld [vmem:[#allocation3 + $0x140] sm:$0xff] }
 0x70f   :  { %4566 = vpow2.f32 %v3364_v14  ;;  %v1769_v14 = vld [vmem:[#allocation3 + $0x68] sm:$0xff] }
 0x710   :  { %4568 = vpow2.f32 %v3365_v18  ;;  %v1767_v18 = vld [vmem:[#allocation3 + $0x58] sm:$0xff]  ;;  %v5332_v19 = vpack.c.bf16 %v1769_v14, %v1765_v13  ;;  %v1800_v13 = vld [vmem:[#allocation3 + $0x160] sm:$0xff]  ;;  %v5382_v14 = vpack.c.bf16 %v1803_v63, %v1799_v7 }
 0x711   :  { %4570 = vtanh.f32 %v4434_v24  ;;  %v1771_v24 = vld [vmem:[#allocation3 + $0x78] sm:$0xff] }
 0x712   :  { %4572 = vpow2.f32 %v3366_v25  ;;  %v1764_v25 = vld [vmem:[#allocation3 + $0x40] sm:$0xff] }
 0x719   :  { %v4567_v17 = vpop.eup %4566 }
 0x71a   :  { %v1408_v27 = vadd.f32 1.0, %v4567_v17  ;;  %v4569_v9 = vpop.eup %4568  ;;  %v1768_v17 = vld [vmem:[#allocation3 + $0x60] sm:$0xff] }
 0x71b   :  { %v1409_v29 = vadd.f32 1.0, %v4569_v9  ;;  %v4571_v34 = vpop.eup %4570  ;;  %v5336_v9 = vpack.c.bf16 %v1768_v17, %v1764_v25  ;;  %v1802_v25 = vld [vmem:[#allocation3 + $0x170] sm:$0xff]  ;;  %v1805_v17 = vld [vmem:[#allocation3 + $0x188] sm:$0xff] }
 0x71c   :  { %4574 = vrcp.f32 %v1408_v27  ;;  %v4573_v36 = vpop.eup %4572  ;;  %v5334_v27 = vpack.c.bf16 %v1771_v24, %v1767_v18  ;;  %v5384_v18 = vpack.c.bf16 %v1800_v13, %v1796_v3  ;;  %v1798_v24 = vld [vmem:[#allocation3 + $0x150] sm:$0xff] }
 0x71d   :  { %4576 = vrcp.f32 %v1409_v29  ;;  %v1410_v45 = vadd.f32 1.0, %v4573_v36  ;;  %v1766_v29 = vld [vmem:[#allocation3 + $0x50] sm:$0xff] }
 0x71f   :  { %4578 = vrcp.f32 %v1410_v45 }
 0x726   :  { %v4575_v38 = vpop.eup %4574 }
 0x727   :  { %v1419_v39 = vmul.f32 %v4575_v38, %v4571_v34  ;;  %v4577_v43 = vpop.eup %4576  ;;  %v1770_v34 = vld [vmem:[#allocation3 + $0x70] sm:$0xff]  ;;  %v1773_v38 = vld [vmem:[#allocation3 + $0x88] sm:$0xff] }
 0x728   :  { %v1418_v46 = vmul.f32 %v4577_v43, %v5233_v56  ;;  %v1763_v56 = vld [vmem:[#allocation3 + $0x38] sm:$0xff]  ;;  %v5339_v36 = vpack.c.bf16 %v1770_v34, %v1766_v29  ;;  %v5387_v29 = vpack.c.bf16 %v1802_v25, %v1798_v24  ;;  %v1809_v34 = vld [vmem:[#allocation3 + $0x1a8] sm:$0xff] }
 0x729   :  { %v4579_v52 = vpop.eup %4578  ;;  %v1775_v43 = vld [vmem:[#allocation3 + $0x98] sm:$0xff] }
 0x72a   :  { %v5275_v48 = vadd.f32 %v1419_v39, %v1418_v46  ;;  %v1777_v39 = vld [vmem:[#allocation3 + $0xa8] sm:$0xff]  ;;  %v1779_v46 = vld [vmem:[#allocation3 + $0xb8] sm:$0xff] }
 0x72b   :  { %v5344_v45 = vpack.c.bf16 %v1777_v39, %v1773_v38  ;;  %v1807_v38 = vld [vmem:[#allocation3 + $0x198] sm:$0xff] }
 0x72c   :  { %4580 = vtanh.f32 %v5275_v48  ;;  %v1811_v39 = vld [vmem:[#allocation3 + $0x1b8] sm:$0xff] }
 0x736   :  { %v4581_v53 = vpop.eup %4580 }
 0x737   :  { %v1422_v6 = vmul.f32 %v4581_v53, %v4579_v52  ;;  %v1776_v52 = vld [vmem:[#allocation3 + $0xa0] sm:$0xff]  ;;  %v5346_v53 = vpack.c.bf16 %v1779_v46, %v1775_v43  ;;  %v5391_v43 = vpack.c.bf16 %v1809_v34, %v1805_v17  ;;  %v5393_v46 = vpack.c.bf16 %v1811_v39, %v1807_v38 }
 0x739   :  { %1488 = vmatmul.mubr.f32.vlgmr.msra.gmra.mrb[14].mxu0 %v1422_v6  ;;  %1559 = vmatmul.mubr.f32.vlgmr.msra.gmra.mrb[14].mxu1 %v1422_v6 }
 0x73a   :  { %3938 = vmatpush1.bf16.msra.mxu0 %v4863_v20  ;;  %3970 = vmatpush1.bf16.msra.mxu1 %v4996_v1 }
 0x73b   :  { %3940 = vmatprep.subr.bf16.mxu0 %v4869_v23  ;;  %3972 = vmatprep.subr.bf16.mxu1 %v4998_v4 }
 0x73c   :  { %1653 = vmatprep.mubr.f32.mxu0 %v4765_v0  ;;  %1724 = vmatprep.mubr.f32.mxu1 %v4765_v0 }
 0x73e   :  { %3942 = vmatpush1.bf16.msra.mxu0 %v4871_v26  ;;  %3974 = vmatpush1.bf16.msra.mxu1 %v5001_v11 }
 0x73f   :  { %3944 = vmatprep.subr.bf16.mxu0 %v4882_v30  ;;  %3976 = vmatprep.subr.bf16.mxu1 %v5005_v12 }
 0x742   :  { %3946 = vmatpush1.bf16.msra.mxu0 %v4884_v33  ;;  %3978 = vmatpush1.bf16.msra.mxu1 %v5008_v21 }
 0x743   :  { %3948 = vmatprep.subr.bf16.mxu0 %v4897_v37  ;;  %3980 = vmatprep.subr.bf16.mxu1 %v5011_v22 }
 0x746   :  { %3950 = vmatpush1.bf16.msra.mxu0 %v4899_v40  ;;  %3982 = vmatpush1.bf16.msra.mxu1 %v5014_v31 }
 0x747   :  { %3952 = vmatprep.subr.bf16.mxu0 %v4912_v44  ;;  %3984 = vmatprep.subr.bf16.mxu1 %v5017_v32 }
 0x74a   :  { %3954 = vmatpush1.bf16.msra.mxu0 %v4914_v47  ;;  %3986 = vmatpush1.bf16.msra.mxu1 %v5020_v41 }
 0x74b   :  { %3956 = vmatprep.subr.bf16.mxu0 %v4927_v51  ;;  %3988 = vmatprep.subr.bf16.mxu1 %v5023_v42 }
 0x74e   :  { %3958 = vmatpush1.bf16.msra.mxu0 %v4929_v54  ;;  %3990 = vmatpush1.bf16.msra.mxu1 %v5026_v49 }
 0x74f   :  { %3960 = vmatprep.subr.bf16.mxu0 %v4939_v58  ;;  %3992 = vmatprep.subr.bf16.mxu1 %v5029_v50  ;;  %v1757_v50 = vld [vmem:[#allocation3 + $0x8] sm:$0xff] }
 0x752   :  { %3962 = vmatpush1.bf16.msra.mxu0 %v4947_v62  ;;  %3994 = vmatpush1.bf16.msra.mxu1 %v5032_v59  ;;  %v1761_v59 = vld [vmem:[#allocation3 + $0x28] sm:$0xff] }
 0x753   :  { %3964 = vmatprep.subr.bf16.mxu0 %v4950_v2  ;;  %3996 = vmatprep.subr.bf16.mxu1 %v5035_v60  ;;  %v1759_v60 = vld [vmem:[#allocation3 + $0x18] sm:$0xff] }
 0x754   :  { %v5322_v57 = vpack.c.bf16 %v1763_v56, %v1759_v60  ;;  %v1797_v60 = vld [vmem:[#allocation3 + $0x148] sm:$0xff] }
 0x755   :  { %v1801_v56 = vld [vmem:[#allocation3 + $0x168] sm:$0xff] }
 0x756   :  { %3966 = vmatpush1.bf16.msra.mxu0 %v4962_v8  ;;  %3998 = vmatpush1.bf16.msra.mxu1 %v5038_v5  ;;  %v5320_v5 = vpack.c.bf16 %v1761_v59, %v1757_v50  ;;  %v1794_v50 = vld [vmem:[#allocation3 + $0x130] sm:$0xff]  ;;  %v5380_v10 = vpack.c.bf16 %v1801_v56, %v1797_v60 }
 0x757   :  { %4032 = vmatprep.subr.bf16.mxu1 %v5322_v57 }
 0x758   :  { %4000 = vmatprep.subr.bf16.mxu0 %v5320_v5 }
 0x80c   :  { %v1489_v20 = vpop.f32.mrb[14].mxu0  ;;  %v1560_v23 = vpop.f32.mrb[14].mxu1 }
 0x80d   :  { %v4421_v26 = vadd.f32 %v1489_v20, %v4981_v15  ;;  %v1491_v30 = vpop.f32.mrb[15].mxu0  ;;  %v1562_v33 = vpop.f32.mrb[15].mxu1  ;;  %v4435_v47 = vadd.f32 %v1560_v23, %v4987_v28  ;;  %v1774_v20 = vld [vmem:[#allocation3 + $0x90] sm:$0xff] }
 0x80e   :  { %v4422_v37 = vadd.f32 %v1491_v30, %v4983_v16  ;;  %v4436_v51 = vadd.f32 %v1562_v33, %v4990_v35  ;;  %v1778_v23 = vld [vmem:[#allocation3 + $0xb0] sm:$0xff]  ;;  %v1781_v30 = vld [vmem:[#allocation3 + $0xc8] sm:$0xff] }
 0x80f   :  { %v3367_v40 = vmul.f32 -1.442695, %v4421_v26  ;;  %v3369_v54 = vmul.f32 -1.442695, %v4435_v47  ;;  %v5351_v26 = vpack.c.bf16 %v1778_v23, %v1774_v20  ;;  %v1785_v33 = vld [vmem:[#allocation3 + $0xe8] sm:$0xff]  ;;  %v1780_v47 = vld [vmem:[#allocation3 + $0xc0] sm:$0xff] }
 0x810   :  { %v3368_v44 = vmul.f32 -1.442695, %v4422_v37  ;;  %v1783_v37 = vld [vmem:[#allocation3 + $0xd8] sm:$0xff]  ;;  %v1806_v20 = vld [vmem:[#allocation3 + $0x190] sm:$0xff] }
 0x811   :  { %4582 = vpow2.f32 %v3367_v40  ;;  %v5356_v40 = vpack.c.bf16 %v1785_v33, %v1781_v30  ;;  %v1810_v30 = vld [vmem:[#allocation3 + $0x1b0] sm:$0xff]  ;;  %v1813_v33 = vld [vmem:[#allocation3 + $0x1c8] sm:$0xff] }
 0x812   :  { %4584 = vpow2.f32 %v3368_v44  ;;  %v1787_v44 = vld [vmem:[#allocation3 + $0xf8] sm:$0xff] }
 0x813   :  { %4586 = vtanh.f32 %v4436_v51  ;;  %v1784_v51 = vld [vmem:[#allocation3 + $0xe0] sm:$0xff] }
 0x814   :  { %4588 = vpow2.f32 %v3369_v54  ;;  %v5358_v54 = vpack.c.bf16 %v1787_v44, %v1783_v37  ;;  %v1817_v37 = vld [vmem:[#allocation3 + $0x1e8] sm:$0xff]  ;;  %v5400_v44 = vpack.c.bf16 %v1810_v30, %v1806_v20 }
 0x81b   :  { %v4583_v58 = vpop.eup %4582 }
 0x81c   :  { %v1574_v62 = vadd.f32 1.0, %v4583_v58  ;;  %v4585_v2 = vpop.eup %4584  ;;  %v5360_v58 = vpack.c.bf16 %v1784_v51, %v1780_v47  ;;  %v5402_v47 = vpack.c.bf16 %v1817_v37, %v1813_v33  ;;  %v1815_v51 = vld [vmem:[#allocation3 + $0x1d8] sm:$0xff] }
 0x81d   :  { %v1575_v8 = vadd.f32 1.0, %v4585_v2  ;;  %v4587_v1 = vpop.eup %4586  ;;  %v1786_v2 = vld [vmem:[#allocation3 + $0xf0] sm:$0xff] }
 0x81e   :  { %4590 = vrcp.f32 %v1574_v62  ;;  %v4589_v4 = vpop.eup %4588  ;;  %v1782_v62 = vld [vmem:[#allocation3 + $0xd0] sm:$0xff] }
 0x81f   :  { %4592 = vrcp.f32 %v1575_v8  ;;  %v1576_v22 = vadd.f32 1.0, %v4589_v4  ;;  %v5363_v8 = vpack.c.bf16 %v1786_v2, %v1782_v62  ;;  %v1793_v4 = vld [vmem:[#allocation3 + $0x128] sm:$0xff]  ;;  %v1819_v62 = vld [vmem:[#allocation3 + $0x1f8] sm:$0xff]  ;;  %v1812_v2 = vld [vmem:[#allocation3 + $0x1c0] sm:$0xff] }
 0x821   :  { %4594 = vrcp.f32 %v1576_v22  ;;  %v1788_v22 = vld [vmem:[#allocation3 + $0x100] sm:$0xff] }
 0x828   :  { %v4591_v11 = vpop.eup %4590 }
 0x829   :  { %v1585_v12 = vmul.f32 %v4591_v11, %v4587_v1  ;;  %v4593_v21 = vpop.eup %4592  ;;  %v1789_v1 = vld [vmem:[#allocation3 + $0x108] sm:$0xff]  ;;  %v1791_v11 = vld [vmem:[#allocation3 + $0x118] sm:$0xff] }
 0x82a   :  { %v1584_v31 = vmul.f32 %v4593_v21, %v5275_v48  ;;  %v1772_v48 = vld [vmem:[#allocation3 + $0x80] sm:$0xff]  ;;  %v1795_v21 = vld [vmem:[#allocation3 + $0x138] sm:$0xff] }
 0x82b   :  { %v4595_v41 = vpop.eup %4594  ;;  %v5348_v6 = vpack.c.bf16 %v1776_v52, %v1772_v48  ;;  %v1804_v48 = vld [vmem:[#allocation3 + $0x180] sm:$0xff] }
 0x82c   :  { %v5315_v32 = vadd.f32 %v1585_v12, %v1584_v31  ;;  %v5368_v12 = vpack.c.bf16 %v1793_v4, %v1789_v1  ;;  %v1792_v31 = vld [vmem:[#allocation3 + $0x120] sm:$0xff]  ;;  %v5404_v1 = vpack.c.bf16 %v1819_v62, %v1815_v51 }
 0x82d   :  { %v1808_v52 = vld [vmem:[#allocation3 + $0x1a0] sm:$0xff] }
 0x82e   :  { %4596 = vtanh.f32 %v5315_v32  ;;  %v5396_v23 = vpack.c.bf16 %v1808_v52, %v1804_v48  ;;  %v1816_v4 = vld [vmem:[#allocation3 + $0x1e0] sm:$0xff] }
 0x838   :  { %v4597_v42 = vpop.eup %4596 }
 0x839   :  { %v1588_v49 = vmul.f32 %v4597_v42, %v4595_v41  ;;  %v5370_v41 = vpack.c.bf16 %v1795_v21, %v1791_v11  ;;  %v5372_v42 = vpack.c.bf16 %v1792_v31, %v1788_v22  ;;  %v1814_v11 = vld [vmem:[#allocation3 + $0x1d0] sm:$0xff]  ;;  %v5407_v22 = vpack.c.bf16 %v1816_v4, %v1812_v2 }
 0x83a   :  { %v1818_v21 = vld [vmem:[#allocation3 + $0x1f0] sm:$0xff] }
 0x83b   :  { %1654 = vmatmul.mubr.f32.vlgmr.msra.gmra.mrb[16].mxu0 %v1588_v49  ;;  %1725 = vmatmul.mubr.f32.vlgmr.msra.gmra.mrb[18].mxu1 %v1588_v49  ;;  %v1790_v49 = vld [vmem:[#allocation3 + $0x110] sm:$0xff]  ;;  %v5411_v31 = vpack.c.bf16 %v1818_v21, %v1814_v11 }
 0x83c   :  { %1884 = vmatprep.mubr.f32.mxu0 %v4765_v0  ;;  %1955 = vmatprep.mubr.f32.mxu1 %v4765_v0  ;;  %v5375_v59 = vpack.c.bf16 %v1794_v50, %v1790_v49 }
 0x83d   :  { %4002 = vmatpush1.bf16.msra.mxu0 %v5324_v61  ;;  %4034 = vmatpush1.bf16.msra.mxu1 %v5327_v55 }
 0x83e   :  { %4004 = vmatprep.subr.bf16.mxu0 %v5332_v19  ;;  %4036 = vmatprep.subr.bf16.mxu1 %v5334_v27 }
 0x841   :  { %4006 = vmatpush1.bf16.msra.mxu0 %v5336_v9  ;;  %4038 = vmatpush1.bf16.msra.mxu1 %v5339_v36 }
 0x842   :  { %4008 = vmatprep.subr.bf16.mxu0 %v5344_v45  ;;  %4040 = vmatprep.subr.bf16.mxu1 %v5346_v53 }
 0x845   :  { %4010 = vmatpush1.bf16.msra.mxu0 %v5348_v6  ;;  %4042 = vmatpush1.bf16.msra.mxu1 %v5351_v26 }
 0x846   :  { %4012 = vmatprep.subr.bf16.mxu0 %v5356_v40  ;;  %4044 = vmatprep.subr.bf16.mxu1 %v5358_v54 }
 0x849   :  { %4014 = vmatpush1.bf16.msra.mxu0 %v5360_v58  ;;  %4046 = vmatpush1.bf16.msra.mxu1 %v5363_v8 }
 0x84a   :  { %4016 = vmatprep.subr.bf16.mxu0 %v5368_v12  ;;  %4048 = vmatprep.subr.bf16.mxu1 %v5370_v41 }
 0x84d   :  { %4018 = vmatpush1.bf16.msra.mxu0 %v5372_v42  ;;  %4050 = vmatpush1.bf16.msra.mxu1 %v5375_v59 }
 0x84e   :  { %4020 = vmatprep.subr.bf16.mxu0 %v5380_v10  ;;  %4052 = vmatprep.subr.bf16.mxu1 %v5382_v14 }
 0x851   :  { %4022 = vmatpush1.bf16.msra.mxu0 %v5384_v18  ;;  %4054 = vmatpush1.bf16.msra.mxu1 %v5387_v29 }
 0x852   :  { %4024 = vmatprep.subr.bf16.mxu0 %v5391_v43  ;;  %4056 = vmatprep.subr.bf16.mxu1 %v5393_v46 }
 0x855   :  { %4026 = vmatpush1.bf16.msra.mxu0 %v5396_v23  ;;  %4058 = vmatpush1.bf16.msra.mxu1 %v5400_v44 }
 0x856   :  { %4028 = vmatprep.subr.bf16.mxu0 %v5402_v47  ;;  %4060 = vmatprep.subr.bf16.mxu1 %v5404_v1 }
 0x859   :  { %4030 = vmatpush1.bf16.msra.mxu0 %v5407_v22  ;;  %4062 = vmatpush1.bf16.msra.mxu1 %v5411_v31 }
 0x85a   :  { %4064 = vmatprep.subr.bf16.mxu0 %v5320_v5  ;;  %4096 = vmatprep.subr.bf16.mxu1 %v5322_v57 }
 0x90e   :  { %v1655_v49 = vpop.f32.mrb[16].mxu0  ;;  %v1726_v50 = vpop.f32.mrb[18].mxu1 }
 0x90f   :  { %v1656_v60 = vadd.f32 %v1655_v49, %v4981_v15  ;;  %v1657_v56 = vpop.f32.mrb[17].mxu0  ;;  %v1728_v7 = vpop.f32.mrb[19].mxu1  ;;  %v1727_v24 = vadd.f32 %v1726_v50, %v4987_v28 }
 0x910   :  { %v1658_v63 = vadd.f32 %v1657_v56, %v4983_v16  ;;  %v1729_v25 = vadd.f32 %v1728_v7, %v4990_v35 }
 0x911   :  { %v3370_v3 = vmul.f32 -1.442695, %v1656_v60  ;;  %v3372_v17 = vmul.f32 -1.442695, %v1727_v24 }
 0x912   :  { %v3371_v13 = vmul.f32 -1.442695, %v1658_v63 }
 0x913   :  { %4598 = vpow2.f32 %v3370_v3 }
 0x914   :  { %4600 = vpow2.f32 %v3371_v13 }
 0x915   :  { %4602 = vtanh.f32 %v1729_v25 }
 0x916   :  { %4604 = vpow2.f32 %v3372_v17 }
 0x91d   :  { %v4599_v34 = vpop.eup %4598 }
 0x91e   :  { %v1740_v38 = vadd.f32 1.0, %v4599_v34  ;;  %v4601_v39 = vpop.eup %4600 }
 0x91f   :  { %v1741_v48 = vadd.f32 1.0, %v4601_v39  ;;  %v4603_v52 = vpop.eup %4602 }
 0x920   :  { %4606 = vrcp.f32 %v1740_v38  ;;  %v4605_v20 = vpop.eup %4604 }
 0x921   :  { %4608 = vrcp.f32 %v1741_v48  ;;  %v1742_v51 = vadd.f32 1.0, %v4605_v20 }
 0x923   :  { %4610 = vrcp.f32 %v1742_v51 }
 0x92a   :  { %v4607_v30 = vpop.eup %4606 }
 0x92b   :  { %v1751_v33 = vmul.f32 %v4607_v30, %v4603_v52  ;;  %v4609_v37 = vpop.eup %4608 }
 0x92c   :  { %v1750_v62 = vmul.f32 %v4609_v37, %v5315_v32 }
 0x92d   :  { %v4611_v4 = vpop.eup %4610 }
 0x92e   :  { %v5423_v2 = vadd.f32 %v1751_v33, %v1750_v62 }
 0x930   :  { %4612 = vtanh.f32 %v5423_v2 }
 0x93a   :  { %v4613_v11 = vpop.eup %4612 }
 0x93b   :  { %v5426_v21 = vmul.f32 %v4613_v11, %v4611_v4 }
 0x93d   :  { %1885 = vmatmul.mubr.f32.vlgmr.msra.gmra.mrb[18].mxu0 %v5426_v21  ;;  %1956 = vmatmul.mubr.f32.vlgmr.msra.gmra.mrb[20].mxu1 %v5426_v21 }
 0x93e   :  { %4066 = vmatpush1.bf16.msra.mxu0 %v5324_v61  ;;  %4098 = vmatpush1.bf16.msra.mxu1 %v5327_v55 }
 0x93f   :  { %4068 = vmatprep.subr.bf16.mxu0 %v5332_v19  ;;  %4100 = vmatprep.subr.bf16.mxu1 %v5334_v27 }
 0x940   :  { %2115 = vmatprep.mubr.f32.mxu0 %v4765_v0  ;;  %2186 = vmatprep.mubr.f32.mxu1 %v4765_v0 }
 0x942   :  { %4070 = vmatpush1.bf16.msra.mxu0 %v5336_v9  ;;  %4102 = vmatpush1.bf16.msra.mxu1 %v5339_v36 }
 0x943   :  { %4072 = vmatprep.subr.bf16.mxu0 %v5344_v45  ;;  %4104 = vmatprep.subr.bf16.mxu1 %v5346_v53 }
 0x946   :  { %4074 = vmatpush1.bf16.msra.mxu0 %v5348_v6  ;;  %4106 = vmatpush1.bf16.msra.mxu1 %v5351_v26 }
 0x947   :  { %4076 = vmatprep.subr.bf16.mxu0 %v5356_v40  ;;  %4108 = vmatprep.subr.bf16.mxu1 %v5358_v54 }
 0x94a   :  { %4078 = vmatpush1.bf16.msra.mxu0 %v5360_v58  ;;  %4110 = vmatpush1.bf16.msra.mxu1 %v5363_v8 }
 0x94b   :  { %4080 = vmatprep.subr.bf16.mxu0 %v5368_v12  ;;  %4112 = vmatprep.subr.bf16.mxu1 %v5370_v41 }
 0x94e   :  { %4082 = vmatpush1.bf16.msra.mxu0 %v5372_v42  ;;  %4114 = vmatpush1.bf16.msra.mxu1 %v5375_v59 }
 0x94f   :  { %4084 = vmatprep.subr.bf16.mxu0 %v5380_v10  ;;  %4116 = vmatprep.subr.bf16.mxu1 %v5382_v14 }
 0x952   :  { %4086 = vmatpush1.bf16.msra.mxu0 %v5384_v18  ;;  %4118 = vmatpush1.bf16.msra.mxu1 %v5387_v29 }
 0x953   :  { %4088 = vmatprep.subr.bf16.mxu0 %v5391_v43  ;;  %4120 = vmatprep.subr.bf16.mxu1 %v5393_v46 }
 0x956   :  { %4090 = vmatpush1.bf16.msra.mxu0 %v5396_v23  ;;  %4122 = vmatpush1.bf16.msra.mxu1 %v5400_v44 }
 0x957   :  { %4092 = vmatprep.subr.bf16.mxu0 %v5402_v47  ;;  %4124 = vmatprep.subr.bf16.mxu1 %v5404_v1 }
 0x95a   :  { %4094 = vmatpush1.bf16.msra.mxu0 %v5407_v22  ;;  %4126 = vmatpush1.bf16.msra.mxu1 %v5411_v31 }
 0x95b   :  { %4128 = vmatprep.subr.bf16.mxu0 %v5320_v5  ;;  %4160 = vmatprep.subr.bf16.mxu1 %v5322_v57 }
 0xa10   :  { %v1886_v32 = vpop.f32.mrb[18].mxu0  ;;  %v1957_v49 = vpop.f32.mrb[20].mxu1 }
 0xa11   :  { %v1887_v50 = vadd.f32 %v1886_v32, %v4981_v15  ;;  %v1888_v60 = vpop.f32.mrb[19].mxu0  ;;  %v1959_v56 = vpop.f32.mrb[21].mxu1  ;;  %v1958_v13 = vadd.f32 %v1957_v49, %v4987_v28 }
 0xa12   :  { %v1889_v7 = vadd.f32 %v1888_v60, %v4983_v16  ;;  %v1960_v24 = vadd.f32 %v1959_v56, %v4990_v35 }
 0xa13   :  { %v3373_v63 = vmul.f32 -1.442695, %v1887_v50  ;;  %v3375_v25 = vmul.f32 -1.442695, %v1958_v13 }
 0xa14   :  { %v3374_v3 = vmul.f32 -1.442695, %v1889_v7 }
 0xa15   :  { %4614 = vpow2.f32 %v3373_v63 }
 0xa16   :  { %4616 = vpow2.f32 %v3374_v3 }
 0xa17   :  { %4618 = vtanh.f32 %v1960_v24 }
 0xa18   :  { %4620 = vpow2.f32 %v3375_v25 }
 0xa1f   :  { %v4615_v17 = vpop.eup %4614 }
 0xa20   :  { %v1971_v34 = vadd.f32 1.0, %v4615_v17  ;;  %v4617_v38 = vpop.eup %4616 }
 0xa21   :  { %v1972_v39 = vadd.f32 1.0, %v4617_v38  ;;  %v4619_v48 = vpop.eup %4618 }
 0xa22   :  { %4622 = vrcp.f32 %v1971_v34  ;;  %v4621_v52 = vpop.eup %4620 }
 0xa23   :  { %4624 = vrcp.f32 %v1972_v39  ;;  %v1973_v37 = vadd.f32 1.0, %v4621_v52 }
 0xa25   :  { %4626 = vrcp.f32 %v1973_v37 }
 0xa2c   :  { %v4623_v20 = vpop.eup %4622 }
 0xa2d   :  { %v1982_v30 = vmul.f32 %v4623_v20, %v4619_v48  ;;  %v4625_v33 = vpop.eup %4624 }
 0xa2e   :  { %v1981_v51 = vmul.f32 %v4625_v33, %v5423_v2 }
 0xa2f   :  { %v4627_v4 = vpop.eup %4626 }
 0xa30   :  { %v5469_v62 = vadd.f32 %v1982_v30, %v1981_v51 }
 0xa32   :  { %4628 = vtanh.f32 %v5469_v62 }
 0xa3c   :  { %v4629_v11 = vpop.eup %4628 }
 0xa3d   :  { %v5472_v32 = vmul.f32 %v4629_v11, %v4627_v4 }
 0xa3f   :  { %2116 = vmatmul.mubr.f32.vlgmr.msra.gmra.mrb[20].mxu0 %v5472_v32  ;;  %2187 = vmatmul.mubr.f32.vlgmr.msra.gmra.mrb[22].mxu1 %v5472_v32 }
 0xa40   :  { %4130 = vmatpush1.bf16.msra.mxu0 %v5324_v61  ;;  %4162 = vmatpush1.bf16.msra.mxu1 %v5327_v55 }
 0xa41   :  { %4132 = vmatprep.subr.bf16.mxu0 %v5332_v19  ;;  %4164 = vmatprep.subr.bf16.mxu1 %v5334_v27 }
 0xa42   :  { %2346 = vmatprep.mubr.f32.mxu0 %v4765_v0  ;;  %2417 = vmatprep.mubr.f32.mxu1 %v4765_v0 }
 0xa44   :  { %4134 = vmatpush1.bf16.msra.mxu0 %v5336_v9  ;;  %4166 = vmatpush1.bf16.msra.mxu1 %v5339_v36 }
 0xa45   :  { %4136 = vmatprep.subr.bf16.mxu0 %v5344_v45  ;;  %4168 = vmatprep.subr.bf16.mxu1 %v5346_v53 }
 0xa48   :  { %4138 = vmatpush1.bf16.msra.mxu0 %v5348_v6  ;;  %4170 = vmatpush1.bf16.msra.mxu1 %v5351_v26 }
 0xa49   :  { %4140 = vmatprep.subr.bf16.mxu0 %v5356_v40  ;;  %4172 = vmatprep.subr.bf16.mxu1 %v5358_v54 }
 0xa4c   :  { %4142 = vmatpush1.bf16.msra.mxu0 %v5360_v58  ;;  %4174 = vmatpush1.bf16.msra.mxu1 %v5363_v8 }
 0xa4d   :  { %4144 = vmatprep.subr.bf16.mxu0 %v5368_v12  ;;  %4176 = vmatprep.subr.bf16.mxu1 %v5370_v41 }
 0xa50   :  { %4146 = vmatpush1.bf16.msra.mxu0 %v5372_v42  ;;  %4178 = vmatpush1.bf16.msra.mxu1 %v5375_v59 }
 0xa51   :  { %4148 = vmatprep.subr.bf16.mxu0 %v5380_v10  ;;  %4180 = vmatprep.subr.bf16.mxu1 %v5382_v14 }
 0xa54   :  { %4150 = vmatpush1.bf16.msra.mxu0 %v5384_v18  ;;  %4182 = vmatpush1.bf16.msra.mxu1 %v5387_v29 }
 0xa55   :  { %4152 = vmatprep.subr.bf16.mxu0 %v5391_v43  ;;  %4184 = vmatprep.subr.bf16.mxu1 %v5393_v46 }
 0xa58   :  { %4154 = vmatpush1.bf16.msra.mxu0 %v5396_v23  ;;  %4186 = vmatpush1.bf16.msra.mxu1 %v5400_v44 }
 0xa59   :  { %4156 = vmatprep.subr.bf16.mxu0 %v5402_v47  ;;  %4188 = vmatprep.subr.bf16.mxu1 %v5404_v1 }
 0xa5c   :  { %4158 = vmatpush1.bf16.msra.mxu0 %v5407_v22  ;;  %4190 = vmatpush1.bf16.msra.mxu1 %v5411_v31 }
 0xa5d   :  { %4192 = vmatprep.subr.bf16.mxu0 %v5320_v5  ;;  %4224 = vmatprep.subr.bf16.mxu1 %v5322_v57 }
 0xb12   :  { %v2117_v2 = vpop.f32.mrb[20].mxu0  ;;  %v2188_v49 = vpop.f32.mrb[22].mxu1 }
 0xb13   :  { %v2118_v50 = vadd.f32 %v2117_v2, %v4981_v15  ;;  %v2119_v60 = vpop.f32.mrb[21].mxu0  ;;  %v2190_v56 = vpop.f32.mrb[23].mxu1  ;;  %v2189_v13 = vadd.f32 %v2188_v49, %v4987_v28  ;;  %v2680_v2 = vld [vmem:[#allocation3] sm:$0xff] }
 0xb14   :  { %v2120_v7 = vadd.f32 %v2119_v60, %v4983_v16  ;;  %v2191_v24 = vadd.f32 %v2190_v56, %v4990_v35  ;;  %v2684_v49 = vld [vmem:[#allocation3 + $0x20] sm:$0xff]  ;;  %v2682_v56 = vld [vmem:[#allocation3 + $0x10] sm:$0xff] }
 0xb15   :  { %v3376_v63 = vmul.f32 -1.442695, %v2118_v50  ;;  %v3378_v25 = vmul.f32 -1.442695, %v2189_v13  ;;  %v5572_v60 = vpack.c.bf16 %v2684_v49, %v2680_v2  ;;  %v2693_v13 = vld [vmem:[#allocation3 + $0x68] sm:$0xff]  ;;  %v2718_v2 = vld [vmem:[#allocation3 + $0x130] sm:$0xff] }
 0xb16   :  { %v3377_v3 = vmul.f32 -1.442695, %v2120_v7  ;;  %v2686_v7 = vld [vmem:[#allocation3 + $0x30] sm:$0xff] }
 0xb17   :  { %4630 = vpow2.f32 %v3376_v63  ;;  %v5575_v63 = vpack.c.bf16 %v2686_v7, %v2682_v56  ;;  %v2721_v56 = vld [vmem:[#allocation3 + $0x148] sm:$0xff] }
 0xb18   :  { %4632 = vpow2.f32 %v3377_v3  ;;  %v2689_v3 = vld [vmem:[#allocation3 + $0x48] sm:$0xff] }
 0xb19   :  { %4634 = vtanh.f32 %v2191_v24  ;;  %v2691_v24 = vld [vmem:[#allocation3 + $0x58] sm:$0xff]  ;;  %v2725_v7 = vld [vmem:[#allocation3 + $0x168] sm:$0xff] }
 0xb1a   :  { %4636 = vpow2.f32 %v3378_v25  ;;  %v5580_v25 = vpack.c.bf16 %v2693_v13, %v2689_v3  ;;  %v2723_v3 = vld [vmem:[#allocation3 + $0x158] sm:$0xff]  ;;  %v5628_v13 = vpack.c.bf16 %v2725_v7, %v2721_v56 }
 0xb21   :  { %v4631_v5 = vpop.eup %4630 }
 0xb22   :  { %v2202_v17 = vadd.f32 1.0, %v4631_v5  ;;  %v4633_v57 = vpop.eup %4632  ;;  %v2695_v5 = vld [vmem:[#allocation3 + $0x78] sm:$0xff] }
 0xb23   :  { %v2203_v34 = vadd.f32 1.0, %v4633_v57  ;;  %v4635_v38 = vpop.eup %4634  ;;  %v2692_v57 = vld [vmem:[#allocation3 + $0x60] sm:$0xff] }
 0xb24   :  { %4638 = vrcp.f32 %v2202_v17  ;;  %v4637_v39 = vpop.eup %4636  ;;  %v2688_v17 = vld [vmem:[#allocation3 + $0x40] sm:$0xff] }
 0xb25   :  { %4640 = vrcp.f32 %v2203_v34  ;;  %v2204_v30 = vadd.f32 1.0, %v4637_v39  ;;  %v5582_v34 = vpack.c.bf16 %v2695_v5, %v2691_v24  ;;  %v2690_v39 = vld [vmem:[#allocation3 + $0x50] sm:$0xff]  ;;  %v2727_v24 = vld [vmem:[#allocation3 + $0x178] sm:$0xff]  ;;  %v2720_v5 = vld [vmem:[#allocation3 + $0x140] sm:$0xff] }
 0xb27   :  { %4642 = vrcp.f32 %v2204_v30  ;;  %v2701_v30 = vld [vmem:[#allocation3 + $0xa8] sm:$0xff] }
 0xb2e   :  { %v4639_v48 = vpop.eup %4638 }
 0xb2f   :  { %v2213_v52 = vmul.f32 %v4639_v48, %v4635_v38  ;;  %v4641_v20 = vpop.eup %4640  ;;  %v5584_v38 = vpack.c.bf16 %v2692_v57, %v2688_v17  ;;  %v2694_v48 = vld [vmem:[#allocation3 + $0x70] sm:$0xff]  ;;  %v2724_v17 = vld [vmem:[#allocation3 + $0x160] sm:$0xff]  ;;  %v5630_v57 = vpack.c.bf16 %v2727_v24, %v2723_v3 }
 0xb30   :  { %v2212_v33 = vmul.f32 %v4641_v20, %v5469_v62  ;;  %v2687_v62 = vld [vmem:[#allocation3 + $0x38] sm:$0xff]  ;;  %v2697_v20 = vld [vmem:[#allocation3 + $0x88] sm:$0xff] }
 0xb31   :  { %v4643_v51 = vpop.eup %4642 }
 0xb32   :  { %v5515_v37 = vadd.f32 %v2213_v52, %v2212_v33  ;;  %v5587_v52 = vpack.c.bf16 %v2694_v48, %v2690_v39  ;;  %v2699_v33 = vld [vmem:[#allocation3 + $0x98] sm:$0xff]  ;;  %v5632_v39 = vpack.c.bf16 %v2724_v17, %v2720_v5  ;;  %v2722_v48 = vld [vmem:[#allocation3 + $0x150] sm:$0xff] }
 0xb34   :  { %4644 = vtanh.f32 %v5515_v37 }
 0xb3e   :  { %v4645_v4 = vpop.eup %4644 }
 0xb3f   :  { %v5518_v11 = vmul.f32 %v4645_v4, %v4643_v51  ;;  %v2703_v51 = vld [vmem:[#allocation3 + $0xb8] sm:$0xff]  ;;  %v2696_v4 = vld [vmem:[#allocation3 + $0x80] sm:$0xff] }
 0xb41   :  { %2347 = vmatmul.mubr.f32.vlgmr.msra.gmra.mrb[22].mxu0 %v5518_v11  ;;  %2418 = vmatmul.mubr.f32.vlgmr.msra.gmra.mrb[24].mxu1 %v5518_v11 }
 0xb42   :  { %4194 = vmatpush1.bf16.msra.mxu0 %v5324_v61  ;;  %4226 = vmatpush1.bf16.msra.mxu1 %v5327_v55 }
 0xb43   :  { %4196 = vmatprep.subr.bf16.mxu0 %v5332_v19  ;;  %4228 = vmatprep.subr.bf16.mxu1 %v5334_v27 }
 0xb44   :  { %2577 = vmatprep.mubr.f32.mxu0 %v4765_v0  ;;  %2648 = vmatprep.mubr.f32.mxu1 %v4765_v0 }
 0xb46   :  { %4198 = vmatpush1.bf16.msra.mxu0 %v5336_v9  ;;  %4230 = vmatpush1.bf16.msra.mxu1 %v5339_v36 }
 0xb47   :  { %4200 = vmatprep.subr.bf16.mxu0 %v5344_v45  ;;  %4232 = vmatprep.subr.bf16.mxu1 %v5346_v53 }
 0xb4a   :  { %4202 = vmatpush1.bf16.msra.mxu0 %v5348_v6  ;;  %4234 = vmatpush1.bf16.msra.mxu1 %v5351_v26 }
 0xb4b   :  { %4204 = vmatprep.subr.bf16.mxu0 %v5356_v40  ;;  %4236 = vmatprep.subr.bf16.mxu1 %v5358_v54 }
 0xb4e   :  { %4206 = vmatpush1.bf16.msra.mxu0 %v5360_v58  ;;  %4238 = vmatpush1.bf16.msra.mxu1 %v5363_v8 }
 0xb4f   :  { %4208 = vmatprep.subr.bf16.mxu0 %v5368_v12  ;;  %4240 = vmatprep.subr.bf16.mxu1 %v5370_v41 }
 0xb52   :  { %4210 = vmatpush1.bf16.msra.mxu0 %v5372_v42  ;;  %4242 = vmatpush1.bf16.msra.mxu1 %v5375_v59 }
 0xb53   :  { %4212 = vmatprep.subr.bf16.mxu0 %v5380_v10  ;;  %4244 = vmatprep.subr.bf16.mxu1 %v5382_v14 }
 0xb56   :  { %4214 = vmatpush1.bf16.msra.mxu0 %v5384_v18  ;;  %4246 = vmatpush1.bf16.msra.mxu1 %v5387_v29 }
 0xb57   :  { %4216 = vmatprep.subr.bf16.mxu0 %v5391_v43  ;;  %4248 = vmatprep.subr.bf16.mxu1 %v5393_v46 }
 0xb5a   :  { %4218 = vmatpush1.bf16.msra.mxu0 %v5396_v23  ;;  %4250 = vmatpush1.bf16.msra.mxu1 %v5400_v44 }
 0xb5b   :  { %4220 = vmatprep.subr.bf16.mxu0 %v5402_v47  ;;  %4252 = vmatprep.subr.bf16.mxu1 %v5404_v1  ;;  %v2681_v47 = vld [vmem:[#allocation3 + $0x8] sm:$0xff] }
 0xb5c   :  { %v2685_v1 = vld [vmem:[#allocation3 + $0x28] sm:$0xff] }
 0xb5e   :  { %4222 = vmatpush1.bf16.msra.mxu0 %v5407_v22  ;;  %4254 = vmatpush1.bf16.msra.mxu1 %v5411_v31  ;;  %v2683_v22 = vld [vmem:[#allocation3 + $0x18] sm:$0xff]  ;;  %v5568_v31 = vpack.c.bf16 %v2685_v1, %v2681_v47  ;;  %v2716_v47 = vld [vmem:[#allocation3 + $0x120] sm:$0xff] }
 0xb5f   :  { %v5570_v50 = vpack.c.bf16 %v2687_v62, %v2683_v22  ;;  %v2714_v62 = vld [vmem:[#allocation3 + $0x110] sm:$0xff] }
 0xb60   :  { %4256 = vmatprep.subr.bf16.mxu0 %v5568_v31  ;;  %v5623_v49 = vpack.c.bf16 %v2718_v2, %v2714_v62  ;;  %v2738_v62 = vld [vmem:[#allocation3 + $0x1d0] sm:$0xff] }
 0xb61   :  { %4288 = vmatprep.subr.bf16.mxu1 %v5570_v50  ;;  %v2742_v2 = vld [vmem:[#allocation3 + $0x1f0] sm:$0xff] }
 0xb62   :  { %v5659_v7 = vpack.c.bf16 %v2742_v2, %v2738_v62 }
 0xc14   :  { %v2348_v61 = vpop.f32.mrb[22].mxu0  ;;  %v2419_v55 = vpop.f32.mrb[24].mxu1 }
 0xc15   :  { %v2349_v19 = vadd.f32 %v2348_v61, %v4981_v15  ;;  %v2350_v27 = vpop.f32.mrb[23].mxu0  ;;  %v2421_v9 = vpop.f32.mrb[25].mxu1  ;;  %v2420_v6 = vadd.f32 %v2419_v55, %v4987_v28  ;;  %v2700_v61 = vld [vmem:[#allocation3 + $0xa0] sm:$0xff]  ;;  %v5594_v55 = vpack.c.bf16 %v2703_v51, %v2699_v33  ;;  %v2733_v51 = vld [vmem:[#allocation3 + $0x1a8] sm:$0xff] }
 0xc16   :  { %v2351_v36 = vadd.f32 %v2350_v27, %v4983_v16  ;;  %v2422_v26 = vadd.f32 %v2421_v9, %v4990_v35  ;;  %v2698_v27 = vld [vmem:[#allocation3 + $0x90] sm:$0xff] }
 0xc17   :  { %v3379_v45 = vmul.f32 -1.442695, %v2349_v19  ;;  %v3381_v40 = vmul.f32 -1.442695, %v2420_v6  ;;  %v5596_v19 = vpack.c.bf16 %v2700_v61, %v2696_v4  ;;  %v2702_v9 = vld [vmem:[#allocation3 + $0xb0] sm:$0xff]  ;;  %v2707_v6 = vld [vmem:[#allocation3 + $0xd8] sm:$0xff] }
 0xc18   :  { %v3380_v53 = vmul.f32 -1.442695, %v2351_v36  ;;  %v5599_v36 = vpack.c.bf16 %v2702_v9, %v2698_v27  ;;  %v2731_v4 = vld [vmem:[#allocation3 + $0x198] sm:$0xff] }
 0xc19   :  { %4646 = vpow2.f32 %v3379_v45  ;;  %v2705_v45 = vld [vmem:[#allocation3 + $0xc8] sm:$0xff]  ;;  %v2735_v61 = vld [vmem:[#allocation3 + $0x1b8] sm:$0xff] }
 0xc1a   :  { %4648 = vpow2.f32 %v3380_v53  ;;  %v2709_v53 = vld [vmem:[#allocation3 + $0xe8] sm:$0xff]  ;;  %v5641_v9 = vpack.c.bf16 %v2735_v61, %v2731_v4 }
 0xc1b   :  { %4650 = vtanh.f32 %v2422_v26  ;;  %v5604_v26 = vpack.c.bf16 %v2709_v53, %v2705_v45  ;;  %v2728_v45 = vld [vmem:[#allocation3 + $0x180] sm:$0xff] }
 0xc1c   :  { %4652 = vpow2.f32 %v3381_v40  ;;  %v2711_v40 = vld [vmem:[#allocation3 + $0xf8] sm:$0xff]  ;;  %v2732_v53 = vld [vmem:[#allocation3 + $0x1a0] sm:$0xff] }
 0xc23   :  { %v4647_v54 = vpop.eup %4646 }
 0xc24   :  { %v2433_v58 = vadd.f32 1.0, %v4647_v54  ;;  %v4649_v8 = vpop.eup %4648  ;;  %v2704_v54 = vld [vmem:[#allocation3 + $0xc0] sm:$0xff] }
 0xc25   :  { %v2434_v12 = vadd.f32 1.0, %v4649_v8  ;;  %v4651_v41 = vpop.eup %4650  ;;  %v5606_v8 = vpack.c.bf16 %v2711_v40, %v2707_v6  ;;  %v2730_v6 = vld [vmem:[#allocation3 + $0x190] sm:$0xff]  ;;  %v5644_v40 = vpack.c.bf16 %v2732_v53, %v2728_v45 }
 0xc26   :  { %4654 = vrcp.f32 %v2433_v58  ;;  %v4653_v42 = vpop.eup %4652  ;;  %v2708_v58 = vld [vmem:[#allocation3 + $0xe0] sm:$0xff] }
 0xc27   :  { %4656 = vrcp.f32 %v2434_v12  ;;  %v2435_v18 = vadd.f32 1.0, %v4653_v42  ;;  %v5608_v12 = vpack.c.bf16 %v2708_v58, %v2704_v54  ;;  %v2710_v42 = vld [vmem:[#allocation3 + $0xf0] sm:$0xff]  ;;  %v2737_v58 = vld [vmem:[#allocation3 + $0x1c8] sm:$0xff] }
 0xc28   :  { %v2734_v54 = vld [vmem:[#allocation3 + $0x1b0] sm:$0xff] }
 0xc29   :  { %4658 = vrcp.f32 %v2435_v18  ;;  %v2715_v18 = vld [vmem:[#allocation3 + $0x118] sm:$0xff] }
 0xc30   :  { %v4655_v59 = vpop.eup %4654 }
 0xc31   :  { %v2444_v10 = vmul.f32 %v4655_v59, %v4651_v41  ;;  %v4657_v14 = vpop.eup %4656  ;;  %v2706_v41 = vld [vmem:[#allocation3 + $0xd0] sm:$0xff] }
 0xc32   :  { %v2443_v29 = vmul.f32 %v4657_v14, %v5515_v37  ;;  %v5592_v37 = vpack.c.bf16 %v2701_v30, %v2697_v20  ;;  %v5611_v59 = vpack.c.bf16 %v2710_v42, %v2706_v41  ;;  %v2717_v14 = vld [vmem:[#allocation3 + $0x128] sm:$0xff]  ;;  %v2726_v20 = vld [vmem:[#allocation3 + $0x170] sm:$0xff]  ;;  %v5648_v42 = vpack.c.bf16 %v2734_v54, %v2730_v6 }
 0xc33   :  { %v4659_v46 = vpop.eup %4658  ;;  %v2729_v30 = vld [vmem:[#allocation3 + $0x188] sm:$0xff]  ;;  %v5635_v33 = vpack.c.bf16 %v2726_v20, %v2722_v48 }
 0xc34   :  { %v5559_v43 = vadd.f32 %v2444_v10, %v2443_v29  ;;  %v2713_v10 = vld [vmem:[#allocation3 + $0x108] sm:$0xff]  ;;  %v5639_v27 = vpack.c.bf16 %v2733_v51, %v2729_v30 }
 0xc35   :  { %v5616_v29 = vpack.c.bf16 %v2717_v14, %v2713_v10  ;;  %v2741_v41 = vld [vmem:[#allocation3 + $0x1e8] sm:$0xff]  ;;  %v2739_v14 = vld [vmem:[#allocation3 + $0x1d8] sm:$0xff] }
 0xc36   :  { %4660 = vtanh.f32 %v5559_v43  ;;  %v5650_v10 = vpack.c.bf16 %v2741_v41, %v2737_v58 }
 0xc40   :  { %v4661_v23 = vpop.eup %4660 }
 0xc41   :  { %v5562_v44 = vmul.f32 %v4661_v23, %v4659_v46  ;;  %v2719_v46 = vld [vmem:[#allocation3 + $0x138] sm:$0xff]  ;;  %v2712_v23 = vld [vmem:[#allocation3 + $0x100] sm:$0xff] }
 0xc42   :  { %v5618_v1 = vpack.c.bf16 %v2719_v46, %v2715_v18  ;;  %v5620_v22 = vpack.c.bf16 %v2716_v47, %v2712_v23  ;;  %v2743_v18 = vld [vmem:[#allocation3 + $0x1f8] sm:$0xff]  ;;  %v2736_v46 = vld [vmem:[#allocation3 + $0x1c0] sm:$0xff] }
 0xc43   :  { %2578 = vmatmul.mubr.f32.vlgmr.msra.gmra.mrb[24].mxu0 %v5562_v44  ;;  %2649 = vmatmul.mubr.f32.vlgmr.msra.gmra.mrb[26].mxu1 %v5562_v44  ;;  %v5652_v23 = vpack.c.bf16 %v2743_v18, %v2739_v14  ;;  %v2740_v47 = vld [vmem:[#allocation3 + $0x1e0] sm:$0xff] }
 0xc44   :  { %2808 = vmatprep.mubr.f32.mxu0 %v4765_v0  ;;  %2879 = vmatprep.mubr.f32.mxu1 %v4765_v0  ;;  %v5655_v56 = vpack.c.bf16 %v2740_v47, %v2736_v46 }
 0xc45   :  { %4258 = vmatpush1.bf16.msra.mxu0 %v5572_v60  ;;  %4290 = vmatpush1.bf16.msra.mxu1 %v5575_v63 }
 0xc46   :  { %4260 = vmatprep.subr.bf16.mxu0 %v5580_v25  ;;  %4292 = vmatprep.subr.bf16.mxu1 %v5582_v34 }
 0xc49   :  { %4262 = vmatpush1.bf16.msra.mxu0 %v5584_v38  ;;  %4294 = vmatpush1.bf16.msra.mxu1 %v5587_v52 }
 0xc4a   :  { %4264 = vmatprep.subr.bf16.mxu0 %v5592_v37  ;;  %4296 = vmatprep.subr.bf16.mxu1 %v5594_v55 }
 0xc4d   :  { %4266 = vmatpush1.bf16.msra.mxu0 %v5596_v19  ;;  %4298 = vmatpush1.bf16.msra.mxu1 %v5599_v36 }
 0xc4e   :  { %4268 = vmatprep.subr.bf16.mxu0 %v5604_v26  ;;  %4300 = vmatprep.subr.bf16.mxu1 %v5606_v8 }
 0xc51   :  { %4270 = vmatpush1.bf16.msra.mxu0 %v5608_v12  ;;  %4302 = vmatpush1.bf16.msra.mxu1 %v5611_v59 }
 0xc52   :  { %4272 = vmatprep.subr.bf16.mxu0 %v5616_v29  ;;  %4304 = vmatprep.subr.bf16.mxu1 %v5618_v1 }
 0xc55   :  { %4274 = vmatpush1.bf16.msra.mxu0 %v5620_v22  ;;  %4306 = vmatpush1.bf16.msra.mxu1 %v5623_v49 }
 0xc56   :  { %4276 = vmatprep.subr.bf16.mxu0 %v5628_v13  ;;  %4308 = vmatprep.subr.bf16.mxu1 %v5630_v57 }
 0xc59   :  { %4278 = vmatpush1.bf16.msra.mxu0 %v5632_v39  ;;  %4310 = vmatpush1.bf16.msra.mxu1 %v5635_v33 }
 0xc5a   :  { %4280 = vmatprep.subr.bf16.mxu0 %v5639_v27  ;;  %4312 = vmatprep.subr.bf16.mxu1 %v5641_v9 }
 0xc5d   :  { %4282 = vmatpush1.bf16.msra.mxu0 %v5644_v40  ;;  %4314 = vmatpush1.bf16.msra.mxu1 %v5648_v42 }
 0xc5e   :  { %4284 = vmatprep.subr.bf16.mxu0 %v5650_v10  ;;  %4316 = vmatprep.subr.bf16.mxu1 %v5652_v23 }
 0xc61   :  { %4286 = vmatpush1.bf16.msra.mxu0 %v5655_v56  ;;  %4318 = vmatpush1.bf16.msra.mxu1 %v5659_v7 }
 0xc62   :  { %4320 = vmatprep.subr.bf16.mxu0 %v5568_v31  ;;  %4352 = vmatprep.subr.bf16.mxu1 %v5570_v50 }
 0xd16   :  { %v2579_v3 = vpop.f32.mrb[24].mxu0  ;;  %v2650_v24 = vpop.f32.mrb[26].mxu1 }
 0xd17   :  { %v2580_v5 = vadd.f32 %v2579_v3, %v4981_v15  ;;  %v2581_v17 = vpop.f32.mrb[25].mxu0  ;;  %v2652_v48 = vpop.f32.mrb[27].mxu1  ;;  %v2651_v4 = vadd.f32 %v2650_v24, %v4987_v28 }
 0xd18   :  { %v2582_v20 = vadd.f32 %v2581_v17, %v4983_v16  ;;  %v2653_v61 = vadd.f32 %v2652_v48, %v4990_v35  ;;  %v3153_v48 = vld [vmem:[%s5835_s4 + $0x20] sm:$0xff] }
 0xd19   :  { %v3382_v30 = vmul.f32 -1.442695, %v2580_v5  ;;  %v3384_v45 = vmul.f32 -1.442695, %v2651_v4  ;;  %v3152_v5 = vld [vmem:[%s5835_s4 + $0x18] sm:$0xff] }
 0xd1a   :  { %v3383_v51 = vmul.f32 -1.442695, %v2582_v20  ;;  %v3154_v20 = vld [vmem:[%s5835_s4 + $0x28] sm:$0xff]  ;;  %v3156_v4 = vld [vmem:[%s5835_s4 + $0x38] sm:$0xff] }
 0xd1b   :  { %4662 = vpow2.f32 %v3382_v30  ;;  %v4390_v30 = vpack.c.bf16 %v3154_v20, %v3153_v48 }
 0xd1c   :  { %4664 = vpow2.f32 %v3383_v51  ;;  %v3155_v51 = vld [vmem:[%s5835_s4 + $0x30] sm:$0xff] }
 0xd1d   :  { %4666 = vtanh.f32 %v2653_v61  ;;  %v4393_v61 = vpack.c.bf16 %v3156_v4, %v3155_v51 }
 0xd1e   :  { %4668 = vpow2.f32 %v3384_v45  ;;  %v3157_v45 = vld [vmem:[%s5835_s4 + $0x40] sm:$0xff] }
 0xd25   :  { %v4663_v31 = vpop.eup %4662 }
 0xd26   :  { %v2664_v53 = vadd.f32 1.0, %v4663_v31  ;;  %v4665_v50 = vpop.eup %4664  ;;  %v3158_v31 = vld [vmem:[%s5835_s4 + $0x48] sm:$0xff] }
 0xd27   :  { %v2665_v6 = vadd.f32 1.0, %v4665_v50  ;;  %v4667_v54 = vpop.eup %4666  ;;  %v3159_v50 = vld [vmem:[%s5835_s4 + $0x50] sm:$0xff] }
 0xd28   :  { %4670 = vrcp.f32 %v2664_v53  ;;  %v4669_v58 = vpop.eup %4668  ;;  %v4396_v53 = vpack.c.bf16 %v3158_v31, %v3157_v45 }
 0xd29   :  { %4672 = vrcp.f32 %v2665_v6  ;;  %v2666_v46 = vadd.f32 1.0, %v4669_v58  ;;  %v3160_v6 = vld [vmem:[%s5835_s4 + $0x58] sm:$0xff]  ;;  %v3161_v58 = vld [vmem:[%s5835_s4 + $0x60] sm:$0xff] }
 0xd2b   :  { %4674 = vrcp.f32 %v2666_v46  ;;  %v3164_v46 = vld [vmem:[%s5835_s4 + $0x78] sm:$0xff] }
 0xd32   :  { %v4671_v41 = vpop.eup %4670 }
 0xd33   :  { %v2675_v14 = vmul.f32 %v4671_v41, %v4667_v54  ;;  %v4673_v18 = vpop.eup %4672  ;;  %v4399_v54 = vpack.c.bf16 %v3160_v6, %v3159_v50  ;;  %v3162_v41 = vld [vmem:[%s5835_s4 + $0x68] sm:$0xff] }
 0xd34   :  { %v2674_v47 = vmul.f32 %v4673_v18, %v5559_v43  ;;  %v4767_v43 = vmov 0.0|0.0   ;;  %v3163_v18 = vld [vmem:[%s5835_s4 + $0x70] sm:$0xff] }
 0xd35   :  { %v4675_v2 = vpop.eup %4674 }
 0xd36   :  { %v5671_v62 = vadd.f32 %v2675_v14, %v2674_v47  ;;  %v4402_v14 = vpack.c.bf16 %v3162_v41, %v3161_v58  ;;  %v4405_v47 = vpack.c.bf16 %v3164_v46, %v3163_v18 }
 0xd38   :  { %4676 = vtanh.f32 %v5671_v62 }
 0xd42   :  { %v4677_v3 = vpop.eup %4676 }
 0xd43   :  { %v5674_v24 = vmul.f32 %v4677_v3, %v4675_v2 }
 0xd45   :  { %2809 = vmatmul.mubr.f32.vlgmr.msra.gmra.mrb[26].mxu0 %v5674_v24  ;;  %2880 = vmatmul.mubr.f32.vlgmr.msra.gmra.mrb[28].mxu1 %v5674_v24 }
 0xd46   :  { %4322 = vmatpush1.bf16.msra.mxu0 %v5572_v60  ;;  %4354 = vmatpush1.bf16.msra.mxu1 %v5575_v63 }
 0xd47   :  { %4324 = vmatprep.subr.bf16.mxu0 %v5580_v25  ;;  %4356 = vmatprep.subr.bf16.mxu1 %v5582_v34 }
 0xd48   :  { %3039 = vmatprep.mubr.f32.mxu0 %v4765_v0  ;;  %3110 = vmatprep.mubr.f32.mxu1 %v4765_v0 }
 0xd4a   :  { %4326 = vmatpush1.bf16.msra.mxu0 %v5584_v38  ;;  %4358 = vmatpush1.bf16.msra.mxu1 %v5587_v52 }
 0xd4b   :  { %4328 = vmatprep.subr.bf16.mxu0 %v5592_v37  ;;  %4360 = vmatprep.subr.bf16.mxu1 %v5594_v55 }
 0xd4e   :  { %4330 = vmatpush1.bf16.msra.mxu0 %v5596_v19  ;;  %4362 = vmatpush1.bf16.msra.mxu1 %v5599_v36 }
 0xd4f   :  { %4332 = vmatprep.subr.bf16.mxu0 %v5604_v26  ;;  %4364 = vmatprep.subr.bf16.mxu1 %v5606_v8 }
 0xd52   :  { %4334 = vmatpush1.bf16.msra.mxu0 %v5608_v12  ;;  %4366 = vmatpush1.bf16.msra.mxu1 %v5611_v59 }
 0xd53   :  { %4336 = vmatprep.subr.bf16.mxu0 %v5616_v29  ;;  %4368 = vmatprep.subr.bf16.mxu1 %v5618_v1 }
 0xd56   :  { %4338 = vmatpush1.bf16.msra.mxu0 %v5620_v22  ;;  %4370 = vmatpush1.bf16.msra.mxu1 %v5623_v49 }
 0xd57   :  { %4340 = vmatprep.subr.bf16.mxu0 %v5628_v13  ;;  %4372 = vmatprep.subr.bf16.mxu1 %v5630_v57 }
 0xd5a   :  { %4342 = vmatpush1.bf16.msra.mxu0 %v5632_v39  ;;  %4374 = vmatpush1.bf16.msra.mxu1 %v5635_v33 }
 0xd5b   :  { %4344 = vmatprep.subr.bf16.mxu0 %v5639_v27  ;;  %4376 = vmatprep.subr.bf16.mxu1 %v5641_v9  ;;  %v3149_v9 = vld [vmem:[%s5835_s4] sm:$0xff] }
 0xd5e   :  { %4346 = vmatpush1.bf16.msra.mxu0 %v5644_v40  ;;  %4378 = vmatpush1.bf16.msra.mxu1 %v5648_v42  ;;  %v3150_v40 = vld [vmem:[%s5835_s4 + $0x8] sm:$0xff] }
 0xd5f   :  { %4348 = vmatprep.subr.bf16.mxu0 %v5650_v10  ;;  %4380 = vmatprep.subr.bf16.mxu1 %v5652_v23  ;;  %v4384_v23 = vpack.c.bf16 %v3150_v40, %v3149_v9 }
 0xd62   :  { %4350 = vmatpush1.bf16.msra.mxu0 %v5655_v56  ;;  %4382 = vmatpush1.bf16.msra.mxu1 %v5659_v7  ;;  %v3151_v7 = vld [vmem:[%s5835_s4 + $0x10] sm:$0xff] }
 0xd63   :  { %4383 = vmatprep.subr.bf16.mxu0 %v4767_v43  ;;  %v4387_v17 = vpack.c.bf16 %v3152_v5, %v3151_v7 }
 0xe18   :  { %v2810_v60 = vpop.f32.mrb[26].mxu0  ;;  %v2881_v63 = vpop.f32.mrb[28].mxu1 }
 0xe19   :  { %v2811_v25 = vadd.f32 %v2810_v60, %v4981_v15  ;;  %v2812_v34 = vpop.f32.mrb[27].mxu0  ;;  %v2883_v38 = vpop.f32.mrb[29].mxu1  ;;  %v2882_v19 = vadd.f32 %v2881_v63, %v4987_v28 }
 0xe1a   :  { %v2813_v52 = vadd.f32 %v2812_v34, %v4983_v16  ;;  %v2884_v36 = vadd.f32 %v2883_v38, %v4990_v35 }
 0xe1b   :  { %v3385_v37 = vmul.f32 -1.442695, %v2811_v25  ;;  %v3387_v26 = vmul.f32 -1.442695, %v2882_v19 }
 0xe1c   :  { %v3386_v55 = vmul.f32 -1.442695, %v2813_v52 }
 0xe1d   :  { %4678 = vpow2.f32 %v3385_v37 }
 0xe1e   :  { %4680 = vpow2.f32 %v3386_v55 }
 0xe1f   :  { %4682 = vtanh.f32 %v2884_v36 }
 0xe20   :  { %4684 = vpow2.f32 %v3387_v26 }
 0xe27   :  { %v4679_v8 = vpop.eup %4678 }
 0xe28   :  { %v2895_v12 = vadd.f32 1.0, %v4679_v8  ;;  %v4681_v59 = vpop.eup %4680 }
 0xe29   :  { %v2896_v29 = vadd.f32 1.0, %v4681_v59  ;;  %v4683_v1 = vpop.eup %4682 }
 0xe2a   :  { %4686 = vrcp.f32 %v2895_v12  ;;  %v4685_v22 = vpop.eup %4684 }
 0xe2b   :  { %4688 = vrcp.f32 %v2896_v29  ;;  %v2897_v39 = vadd.f32 1.0, %v4685_v22 }
 0xe2d   :  { %4690 = vrcp.f32 %v2897_v39 }
 0xe34   :  { %v4687_v49 = vpop.eup %4686 }
 0xe35   :  { %v2906_v13 = vmul.f32 %v4687_v49, %v4683_v1  ;;  %v4689_v57 = vpop.eup %4688 }
 0xe36   :  { %v2905_v33 = vmul.f32 %v4689_v57, %v5671_v62 }
 0xe37   :  { %v4691_v42 = vpop.eup %4690 }
 0xe38   :  { %v5716_v27 = vadd.f32 %v2906_v13, %v2905_v33 }
 0xe3a   :  { %4692 = vtanh.f32 %v5716_v27 }
 0xe44   :  { %v4693_v10 = vpop.eup %4692 }
 0xe45   :  { %v2909_v56 = vmul.f32 %v4693_v10, %v4691_v42 }
 0xe47   :  { %3040 = vmatmul.mubr.f32.vlgmr.msra.gmra.mrb[28].mxu0 %v2909_v56  ;;  %3111 = vmatmul.mubr.f32.vlgmr.msra.gmra.mrb[30].mxu1 %v2909_v56 }
 0xe48   :  { %4385 = vmatpush3.bf16.msra.mxu0 %v4384_v23  ;;  %3454 = vmatprep.mubr.msk.f32.mxu0 %vm4768_vm4, %v4765_v0 }
 0xe49   :  { %4386 = vmatprep.subr.bf16.mxu0 %v4767_v43 }
 0xe4c   :  { %4388 = vmatpush3.bf16.msra.mxu0 %v4387_v17 }
 0xe4d   :  { %4389 = vmatprep.subr.bf16.mxu0 %v4767_v43 }
 0xe50   :  { %4391 = vmatpush3.bf16.msra.mxu0 %v4390_v30 }
 0xe51   :  { %4392 = vmatprep.subr.bf16.mxu0 %v4767_v43 }
 0xe54   :  { %4394 = vmatpush3.bf16.msra.mxu0 %v4393_v61 }
 0xe55   :  { %4395 = vmatprep.subr.bf16.mxu0 %v4767_v43 }
 0xe58   :  { %4397 = vmatpush3.bf16.msra.mxu0 %v4396_v53 }
 0xe59   :  { %4398 = vmatprep.subr.bf16.mxu0 %v4767_v43 }
 0xe5c   :  { %4400 = vmatpush3.bf16.msra.mxu0 %v4399_v54 }
 0xe5d   :  { %4401 = vmatprep.subr.bf16.mxu0 %v4767_v43 }
 0xe60   :  { %4403 = vmatpush3.bf16.msra.mxu0 %v4402_v14 }
 0xe61   :  { %4404 = vmatprep.subr.bf16.mxu0 %v4767_v43 }
 0xe64   :  { %4406 = vmatpush3.bf16.msra.mxu0 %v4405_v47 }
 0xe67   :  { %3455 = vmatmul.mubr.f32.vlgmr.msra.gmra.mrb[30].mxu0 %v5426_v21 }
 0xe68   :  { %3457 = vmatprep.mubr.msk.f32.mxu0 %vm4768_vm4, %v4765_v0 }
 0xe6b   :  { %3458 = vmatmul.mubr.f32.gmra.mrb[32].mxu0 %v5472_v32 }
 0xe6c   :  { %3460 = vmatprep.mubr.msk.f32.mxu0 %vm4768_vm4, %v4765_v0 }
 0xe6f   :  { %3461 = vmatmul.mubr.f32.gmra.mrb[34].mxu0 %v5518_v11 }
 0xe70   :  { %3463 = vmatprep.mubr.msk.f32.mxu0 %vm4768_vm4, %v4765_v0 }
 0xe73   :  { %3464 = vmatmul.mubr.f32.gmra.mrb[36].mxu0 %v5562_v44 }
 0xe74   :  { %3466 = vmatprep.mubr.msk.f32.mxu0 %vm4768_vm4, %v4765_v0 }
 0xe77   :  { %3467 = vmatmul.mubr.f32.gmra.mrb[38].mxu0 %v5674_v24 }
 0xe78   :  { %3469 = vmatprep.mubr.msk.f32.mxu0 %vm4768_vm4, %v4765_v0 }
 0xe7b   :  { %3470 = vmatmul.mubr.f32.gmra.mrb[40].mxu0 %v2909_v56 }
 0xe7c   :  { %3472 = vmatprep.mubr.msk.f32.mxu0 %vm4768_vm4, %v4765_v0 }
 0xf1a   :  { %v3041_v21 = vpop.f32.mrb[28].mxu0  ;;  %v3112_v32 = vpop.f32.mrb[30].mxu1 }
 0xf1b   :  { %v3042_v11 = vadd.f32 %v3041_v21, %v4981_v15  ;;  %v3043_v62 = vpop.f32.mrb[29].mxu0  ;;  %v3114_v2 = vpop.f32.mrb[31].mxu1  ;;  %v3113_v24 = vadd.f32 %v3112_v32, %v4987_v28  ;;  %v5800_v28 = vld [vmem:[%s5836_s5] ss:$0 sm:$0xff] }
 0xf1c   :  { %v3044_v44 = vadd.f32 %v3043_v62, %v4983_v16  ;;  %v3115_v60 = vadd.f32 %v3114_v2, %v4990_v35 }
 0xf1d   :  { %v3388_v3 = vmul.f32 -1.442695, %v3042_v11  ;;  %v3390_v63 = vmul.f32 -1.442695, %v3113_v24 }
 0xf1e   :  { %v3389_v43 = vmul.f32 -1.442695, %v3044_v44 }
 0xf1f   :  { %4694 = vpow2.f32 %v3388_v3 }
 0xf20   :  { %4696 = vpow2.f32 %v3389_v43 }
 0xf21   :  { %4698 = vtanh.f32 %v3115_v60 }
 0xf22   :  { %4700 = vpow2.f32 %v3390_v63 }
 0xf29   :  { %v4695_v25 = vpop.eup %4694 }
 0xf2a   :  { %v3126_v34 = vadd.f32 1.0, %v4695_v25  ;;  %v4697_v0 = vpop.eup %4696 }
 0xf2b   :  { %v3127_v15 = vadd.f32 1.0, %v4697_v0  ;;  %v4699_v38 = vpop.eup %4698 }
 0xf2c   :  { %4702 = vrcp.f32 %v3126_v34  ;;  %v4701_v52 = vpop.eup %4700 }
 0xf2d   :  { %4704 = vrcp.f32 %v3127_v15  ;;  %v3128_v19 = vadd.f32 1.0, %v4701_v52 }
 0xf2f   :  { %4706 = vrcp.f32 %v3128_v19 }
 0xf36   :  { %v4703_v16 = vpop.eup %4702 }
 0xf37   :  { %v3137_v37 = vmul.f32 %v4703_v16, %v4699_v38  ;;  %v4705_v55 = vpop.eup %4704 }
 0xf38   :  { %v3136_v35 = vmul.f32 %v4705_v55, %v5716_v27 }
 0xf39   :  { %v4707_v27 = vpop.eup %4706 }
 0xf3a   :  { %v3238_v36 = vpop.f32.mrb[30].mxu0  ;;  %v3138_v26 = vadd.f32 %v3137_v37, %v3136_v35 }
 0xf3b   :  { %v3239_v8 = vadd.f32 %v5800_v28, %v3238_v36  ;;  %v3456_v12 = vpop.f32.mrb[31].mxu0 }
 0xf3c   :  { %4708 = vtanh.f32 %v3138_v26 }
 0xf3d   :  { %v3392_v59 = vmul.f32 -1.442695, %v3239_v8 }
 0xf3e   :  { %v3243_v29 = vpop.f32.mrb[32].mxu0 }
 0xf3f   :  { %4710 = vpow2.f32 %v3392_v59  ;;  %v3244_v1 = vadd.f32 %v5800_v28, %v3243_v29  ;;  %v3459_v22 = vpop.f32.mrb[33].mxu0 }
 0xf41   :  { %v3393_v49 = vmul.f32 -1.442695, %v3244_v1 }
 0xf42   :  { %v3248_v13 = vpop.f32.mrb[34].mxu0 }
 0xf43   :  { %4712 = vpow2.f32 %v3393_v49  ;;  %v3249_v57 = vadd.f32 %v5800_v28, %v3248_v13  ;;  %v3462_v39 = vpop.f32.mrb[35].mxu0 }
 0xf45   :  { %v3394_v33 = vmul.f32 -1.442695, %v3249_v57 }
 0xf46   :  { %v3253_v9 = vpop.f32.mrb[36].mxu0  ;;  %v4709_v40 = vpop.eup %4708 }
 0xf47   :  { %4714 = vpow2.f32 %v3394_v33  ;;  %v3254_v42 = vadd.f32 %v5800_v28, %v3253_v9  ;;  %v3465_v10 = vpop.f32.mrb[37].mxu0  ;;  %v3140_v23 = vmul.f32 %v4709_v40, %v4707_v27 }
 0xf49   :  { %v4711_v56 = vpop.eup %4710  ;;  %v3395_v7 = vmul.f32 -1.442695, %v3254_v42  ;;  %3473 = vmatmul.mubr.f32.gmra.mrb[42].mxu0 %v3140_v23 }
 0xf4a   :  { %v3293_v5 = vadd.f32 1.0, %v4711_v56  ;;  %v3258_v17 = vpop.f32.mrb[38].mxu0 }
 0xf4b   :  { %4716 = vpow2.f32 %v3395_v7  ;;  %v3259_v48 = vadd.f32 %v5800_v28, %v3258_v17  ;;  %v3468_v20 = vpop.f32.mrb[39].mxu0 }
 0xf4c   :  { %4718 = vrcp.f32 %v3293_v5 }
 0xf4d   :  { %v4713_v30 = vpop.eup %4712  ;;  %v3396_v51 = vmul.f32 -1.442695, %v3259_v48 }
 0xf4e   :  { %v3294_v4 = vadd.f32 1.0, %v4713_v30  ;;  %v3263_v61 = vpop.f32.mrb[40].mxu0 }
 0xf4f   :  { %4720 = vpow2.f32 %v3396_v51  ;;  %v3264_v45 = vadd.f32 %v5800_v28, %v3263_v61  ;;  %v3471_v31 = vpop.f32.mrb[41].mxu0 }
 0xf50   :  { %4722 = vrcp.f32 %v3294_v4 }
 0xf51   :  { %v4715_v53 = vpop.eup %4714  ;;  %v3397_v50 = vmul.f32 -1.442695, %v3264_v45 }
 0xf52   :  { %v3295_v6 = vadd.f32 1.0, %v4715_v53 }
 0xf53   :  { %4724 = vpow2.f32 %v3397_v50 }
 0xf54   :  { %4726 = vrcp.f32 %v3295_v6 }
 0xf55   :  { %v4717_v54 = vpop.eup %4716 }
 0xf56   :  { %v4719_v58 = vpop.eup %4718  ;;  %v3296_v41 = vadd.f32 1.0, %v4717_v54 }
 0xf57   :  { %3314 = vst [vmem:[%s5837_s6] sm:$0xff] %v4719_v58 }
 0xf58   :  { %4728 = vrcp.f32 %v3296_v41 }
 0xf59   :  { %v4721_v14 = vpop.eup %4720 }
 0xf5a   :  { %v4723_v18 = vpop.eup %4722  ;;  %v3297_v46 = vadd.f32 1.0, %v4721_v14 }
 0xf5b   :  { %3315 = vst [vmem:[%s5837_s6 + $0x8] sm:$0xff] %v4723_v18 }
 0xf5c   :  { %4730 = vrcp.f32 %v3297_v46 }
 0xf5d   :  { %v4725_v47 = vpop.eup %4724 }
 0xf5e   :  { %v4727_v21 = vpop.eup %4726  ;;  %v3298_v32 = vadd.f32 1.0, %v4725_v47 }
 0xf5f   :  { %3316 = vst [vmem:[%s5837_s6 + $0x10] sm:$0xff] %v4727_v21 }
 0xf60   :  { %4732 = vrcp.f32 %v3298_v32 }
 0xf62   :  { %v4729_v11 = vpop.eup %4728 }
 0xf63   :  { %3317 = vst [vmem:[%s5837_s6 + $0x18] sm:$0xff] %v4729_v11 }
 0xf66   :  { %v4731_v62 = vpop.eup %4730 }
 0xf67   :  { %3318 = vst [vmem:[%s5837_s6 + $0x20] sm:$0xff] %v4731_v62 }
 0xf6a   :  { %v4733_v2 = vpop.eup %4732 }
 0xf6b   :  { %3319 = vst [vmem:[%s5837_s6 + $0x28] sm:$0xff] %v4733_v2 }
0x101c   :  { %v3268_v44 = vpop.f32.mrb[42].mxu0 }
0x101d   :  { %v3269_v3 = vadd.f32 %v5800_v28, %v3268_v44  ;;  %v3474_v43 = vpop.f32.mrb[43].mxu0 }
0x101f   :  { %v3398_v24 = vmul.f32 -1.442695, %v3269_v3 }
0x1021   :  { %4734 = vpow2.f32 %v3398_v24 }
0x102b   :  { %v4735_v60 = vpop.eup %4734 }
0x102c   :  { %v3299_v63 = vadd.f32 1.0, %v4735_v60 }
0x102e   :  { %4736 = vrcp.f32 %v3299_v63 }
0x1038   :  { %v4737_v25 = vpop.eup %4736 }
0x1039   :  { %3320 = vst [vmem:[%s5837_s6 + $0x30] sm:$0xff] %v4737_v25 }
0x103a   :  { %3325 = vsyncpa [#allocation4], 1 }

</bundles_post_ra>
